<compile_context>
chip_gen: v5e
topology: v5e:2x2
jax: 0.10.0
libtpu: 0.0.40
codegen_flags: <defaults>
</compile_context>

<pallas_src>
import functools

import jax
import jax.numpy as jnp
from jax.experimental import pallas as pl
from jax.experimental.pallas import tpu as pltpu

_BN_EPS = 1e-5


def _round_up(x, m):
    return ((x + m - 1) // m) * m


def _pick_vmem_limit():
    """Scoped-VMEM budget: 64 MiB on 128-MiB parts (v5e/v6e), 32 MiB on v7x."""
    try:
        cap = pltpu.get_tpu_info().vmem_capacity_bytes
        return int(min(cap // 2, 64 * 1024 * 1024))
    except Exception:
        return 32 * 1024 * 1024  # conservative fallback, safe on every gen


def _pick_group(batch, m_img, per_img_bytes, fixed_bytes, budget_bytes,
                m_cap=1024):
    """Images per grid step: keep >= 2 grid steps when batch >= 2 (so both v7x
    TensorCores get work), cap the per-step pixel count, and fit the VMEM
    budget (inputs/outputs double-buffered)."""
    best = 1
    for g in range(1, batch + 1):
        if batch % g:
            continue
        if batch >= 2 and batch // g < 2:
            continue
        if g * m_img > max(m_cap, m_img):
            continue
        if fixed_bytes + g * per_img_bytes > budget_bytes:
            continue
        best = g
    return best


# ---------------------------------------------------------------------------
# Fused Res_block kernel:  conv3x3(s)+BN+ReLU -> conv3x3(1)+BN -> (+shortcut)
# ---------------------------------------------------------------------------
def _res_block_kernel(*refs, stride, wo_valid, has_proj):
    if has_proj:
        (xph_ref, w1_ref, b1_ref, w2_ref, b2_ref, ws_ref, bs_ref,
         o_ref, y1_ref) = refs
    else:
        (xph_ref, w1_ref, b1_ref, w2_ref, b2_ref, o_ref, y1_ref) = refs
        ws_ref = bs_ref = None

    s = stride
    G, Ho, Wop, cout = o_ref.shape
    M = G * Ho * Wop

    def taps(img, rs, cs):
        # (G, *, *, C) shifted window -> (M, C).  Wop is a multiple of 8, so
        # collapsing (G, Ho, Wop) into the sublane axis is layout-preserving.
        return img[:, rs:rs + Ho, cs:cs + Wop, :].reshape(M, img.shape[-1])

    # Each stride-phase of the padded input image group, resident in VMEM.
    phases = [xph_ref[p] for p in range(s * s)]        # (G, Hq, Wq, cin) bf16

    # ---- conv1 (3x3, stride s) + folded BN + ReLU -------------------------
    acc = jnp.broadcast_to(b1_ref[...], (M, cout))      # f32 bias-initialized
    for di in range(3):
        for dj in range(3):
            a = taps(phases[(di % s) * s + (dj % s)], di // s, dj // s)
            acc = acc + jnp.dot(a, w1_ref[di * 3 + dj],
                                preferred_element_type=jnp.float32)
    y1 = jnp.maximum(acc, 0.0).astype(jnp.bfloat16)

    # ---- stage y1 in a zero-padded bf16 VMEM scratch (conv2's halo) -------
    y1_ref[...] = jnp.zeros_like(y1_ref)
    y1_img = y1.reshape(G, Ho, Wop, cout)
    y1_ref[:, 1:1 + Ho, 1:1 + wo_valid, :] = y1_img[:, :, :wo_valid, :]

    # ---- conv2 (3x3, stride 1, pad 1) + folded BN --------------------------
    acc2 = jnp.broadcast_to(b2_ref[...], (M, cout))
    y1p = y1_ref[...]
    for di in range(3):
        for dj in range(3):
            a = taps(y1p, di, dj)
            acc2 = acc2 + jnp.dot(a, w2_ref[di * 3 + dj],
                                  preferred_element_type=jnp.float32)

    # ---- shortcut: 1x1 projection conv + BN, or identity -------------------
    if has_proj:
        a = taps(phases[(1 % s) * s + (1 % s)], 1 // s, 1 // s)
        res = jnp.dot(a, ws_ref[...], preferred_element_type=jnp.float32)
        res = res + bs_ref[...]
    else:
        res = taps(phases[0], 1, 1).astype(jnp.float32)

    out = acc2 + res                       # no final ReLU (matches the module)
    o_ref[...] = out.reshape(G, Ho, Wop, cout).astype(o_ref.dtype)


# ---------------------------------------------------------------------------
# Wrapper glue: padding / stride-phase split, BN folding, parameter setup
# ---------------------------------------------------------------------------
def _phase_split(x_nhwc, stride, Ho, Wo, Wop):
    """Zero-pad (pad=1) and split into stride^2 phase images, in bf16.

    Returns xph of shape (stride^2, B, Hq, Wq, C) such that
        xph[ph*stride + pw, b, r, c] == x_pad[b, r*stride + ph, c*stride + pw]
    so conv tap (di, dj) of output pixel (i, j) reads
        xph[(di % s)*s + (dj % s), b, i + di//s, j + dj//s].
    Columns beyond the true padded width are zero and only feed the discarded
    Wo..Wop-1 output columns.
    """
    s = stride
    halo = 2 // s
    Hq, Wq = Ho + halo, Wop + halo
    xp = jnp.pad(x_nhwc.astype(jnp.bfloat16), ((0, 0), (1, 1), (1, 1), (0, 0)))
    phases = []
    for ph in range(s):
        for pw in range(s):
            v = xp[:, ph::s, pw::s, :][:, :Hq, :Wq, :]
            v = jnp.pad(v, ((0, 0), (0, Hq - v.shape[1]),
                            (0, Wq - v.shape[2]), (0, 0)))
            phases.append(v)
    return jnp.stack(phases, axis=0)


def conv_weight_to_taps(w_oihw):
    # (Cout, Cin, kh, kw) -> (kh*kw, Cin, Cout), tap index = di*kw + dj
    cout, cin, kh, kw = w_oihw.shape
    return jnp.transpose(w_oihw, (2, 3, 1, 0)).reshape(kh * kw, cin, cout)


def fold_bn_into_weight(w_taps, bn):
    """Fold inference-mode BN scale into the Cout axis; return (w, bias)."""
    scale = bn["gamma"] * jax.lax.rsqrt(bn["var"] + _BN_EPS)
    bias = bn["beta"] - bn["mean"] * scale
    return w_taps * scale, bias


def init_res_block_params(key, cin, cout):
    k1, k2, k3, k4, k5, k6 = jax.random.split(key, 6)

    def bn_params(k, c):
        a, b, c_, d = jax.random.split(k, 4)
        return dict(
            gamma=1.0 + 0.1 * jax.random.normal(a, (c,), jnp.float32),
            beta=0.1 * jax.random.normal(b, (c,), jnp.float32),
            mean=0.1 * jax.random.normal(c_, (c,), jnp.float32),
            var=1.0 + 0.1 * jax.random.uniform(d, (c,), jnp.float32),
        )

    params = dict(
        w1=0.1 * jax.random.normal(k1, (cout, cin, 3, 3), jnp.float32),
        w2=0.1 * jax.random.normal(k2, (cout, cout, 3, 3), jnp.float32),
        bn1=bn_params(k3, cout),
        bn2=bn_params(k4, cout),
        ws=None,
        bns=None,
    )
    if cin != cout:  # matches the PyTorch module's shortcut condition
        params["ws"] = 0.1 * jax.random.normal(k5, (cout, cin, 1, 1), jnp.float32)
        params["bns"] = bn_params(k6, cout)
    return params


# ---------------------------------------------------------------------------
# Res_block forward (one fused pallas_call)
# ---------------------------------------------------------------------------
def res_block_forward(x_nchw, params, stride=1):
    assert stride in (1, 2), "ResNet basic blocks use stride 1 or 2"
    x = jnp.transpose(x_nchw, (0, 2, 3, 1))                       # NCHW -> NHWC
    B, H, W, cin = x.shape
    cout = params["w1"].shape[0]
    if stride != 1:
        assert H % stride == 0 and W % stride == 0
    Ho, Wo = H // stride, W // stride
    Wop = _round_up(Wo, 8)            # sublane-aligned padded output width
    s2 = stride * stride

    has_proj = params["ws"] is not None
    if not has_proj:
        assert cin == cout and stride == 1, (
            "identity shortcut needs in_channels == out_channels (and stride 1 "
            "for the shapes to line up, as in the PyTorch module)")

    # Fold inference-mode BN into bf16 tap-major weights + f32 biases.
    w1m, b1 = fold_bn_into_weight(conv_weight_to_taps(params["w1"]), params["bn1"])
    w2m, b2 = fold_bn_into_weight(conv_weight_to_taps(params["w2"]), params["bn2"])
    w1m = w1m.astype(jnp.bfloat16)                                # (9, cin,  cout)
    w2m = w2m.astype(jnp.bfloat16)                                # (9, cout, cout)
    b1 = b1.reshape(1, cout).astype(jnp.float32)
    b2 = b2.reshape(1, cout).astype(jnp.float32)
    if has_proj:
        wsm, bs = fold_bn_into_weight(conv_weight_to_taps(params["ws"]),
                                      params["bns"])
        wsm = wsm[0].astype(jnp.bfloat16)                         # (cin, cout)
        bs = bs.reshape(1, cout).astype(jnp.float32)

    # Single bf16 materialization of the padded / stride-phase-split input.
    xph = _phase_split(x, stride, Ho, Wo, Wop)      # (s^2, B, Hq, Wq, cin)
    _, _, Hq, Wq, _ = xph.shape

    # Images per grid step (G) under a per-generation VMEM budget.
    vmem_limit = _pick_vmem_limit()
    w_bytes = 2 * (w1m.size + w2m.size) + 4 * (b1.size + b2.size)
    if has_proj:
        w_bytes += 2 * wsm.size + 4 * bs.size
    per_img = (2 * s2 * Hq * Wq * cin * 2           # input block (x2 buffers)
               + 2 * Ho * Wop * cout * 4            # output block (x2 buffers)
               + (Ho + 2) * (Wop + 2) * cout * 2)   # y1 VMEM scratch
    G = _pick_group(B, Ho * Wop, per_img, 2 * w_bytes, int(0.6 * vmem_limit))

    in_specs = [
        pl.BlockSpec((s2, G, Hq, Wq, cin), lambda i: (0, i, 0, 0, 0)),
        pl.BlockSpec((9, cin, cout), lambda i: (0, 0, 0)),
        pl.BlockSpec((1, cout), lambda i: (0, 0)),
        pl.BlockSpec((9, cout, cout), lambda i: (0, 0, 0)),
        pl.BlockSpec((1, cout), lambda i: (0, 0)),
    ]
    args = [xph, w1m, b1, w2m, b2]
    if has_proj:
        in_specs += [pl.BlockSpec((cin, cout), lambda i: (0, 0)),
                     pl.BlockSpec((1, cout), lambda i: (0, 0))]
        args += [wsm, bs]

    kernel = functools.partial(_res_block_kernel, stride=stride,
                               wo_valid=Wo, has_proj=has_proj)

    out = pl.pallas_call(
        kernel,
        out_shape=jax.ShapeDtypeStruct((B, Ho, Wop, cout), jnp.float32),
        grid=(B // G,),
        in_specs=in_specs,
        out_specs=pl.BlockSpec((G, Ho, Wop, cout), lambda i: (i, 0, 0, 0)),
        scratch_shapes=[pltpu.VMEM((G, Ho + 2, Wop + 2, cout), jnp.bfloat16)],
        compiler_params=pltpu.CompilerParams(
            dimension_semantics=("parallel",),
            vmem_limit_bytes=vmem_limit,
        ),
    )(*args)

    if Wop != Wo:
        out = out[:, :, :Wo, :]
    return jnp.transpose(out, (0, 3, 1, 2))                       # -> NCHW


# ---------------------------------------------------------------------------
# Pure-JAX reference (bf16 conv operands / bf16 y1 to match kernel numerics)
# ---------------------------------------------------------------------------
def res_block_reference(x_nchw, params, stride=1):
    x = jnp.transpose(x_nchw, (0, 2, 3, 1)).astype(jnp.float32)

    def conv(v, w_oihw, s, p):
        w_hwio = jnp.transpose(w_oihw, (2, 3, 1, 0))
        return jax.lax.conv_general_dilated(
            v.astype(jnp.bfloat16), w_hwio.astype(jnp.bfloat16),
            window_strides=(s, s), padding=[(p, p), (p, p)],
            dimension_numbers=("NHWC", "HWIO", "NHWC"),
            preferred_element_type=jnp.float32)

    def bn(v, pr):
        sc = pr["gamma"] * jax.lax.rsqrt(pr["var"] + _BN_EPS)
        return v * sc + (pr["beta"] - pr["mean"] * sc)

    y = jnp.maximum(bn(conv(x, params["w1"], stride, 1), params["bn1"]), 0.0)
    y = y.astype(jnp.bfloat16).astype(jnp.float32)     # kernel stages y1 in bf16
    y = bn(conv(y, params["w2"], 1, 1), params["bn2"])
    if params["ws"] is not None:
        r = bn(conv(x, params["ws"], stride, 0), params["bns"])
    else:
        r = x
    return jnp.transpose(y + r, (0, 3, 1, 2))


if __name__ == "__main__":
    key = jax.random.PRNGKey(0)
    kx, kp, kx2, kp2 = jax.random.split(key, 4)

    # Case 1: projection shortcut (cin != cout), stride 2 — stage transition.
    B, CIN, COUT, HW, STRIDE = 2, 4, 8, 16, 2
    x = jax.random.normal(kx, (B, CIN, HW, HW), jnp.float32)
    params = init_res_block_params(kp, CIN, COUT)
    fwd = jax.jit(functools.partial(res_block_forward, stride=STRIDE))
    out = jax.block_until_ready(fwd(x, params))
    expected = (B, COUT, HW // STRIDE, HW // STRIDE)
    assert out.shape == expected, (out.shape, expected)
    assert out.dtype == jnp.float32
    assert bool(jnp.all(jnp.isfinite(out)))
    ref = res_block_reference(x, params, stride=STRIDE)
    err = float(jnp.max(jnp.abs(out - ref)))
    assert err < 0.1, f"projection-block max abs err vs reference: {err}"

    # Case 2: identity shortcut (cin == cout), stride 1.
    B2, C2, HW2 = 2, 8, 8
    x2 = jax.random.normal(kx2, (B2, C2, HW2, HW2), jnp.float32)
    params2 = init_res_block_params(kp2, C2, C2)
    out2 = jax.block_until_ready(jax.jit(res_block_forward)(x2, params2))
    assert out2.shape == (B2, C2, HW2, HW2)
    assert bool(jnp.all(jnp.isfinite(out2)))
    ref2 = res_block_reference(x2, params2, stride=1)
    err2 = float(jnp.max(jnp.abs(out2 - ref2)))
    assert err2 < 0.1, f"identity-block max abs err vs reference: {err2}"

    print("KERNEL_OK")
</pallas_src>

<mosaic_0001>
module attributes {stable_mosaic.version = 11 : i64} {
  func.func @_res_block_kernel(%arg0: i32, %arg1: memref<4x1x9x9x4xbf16, #tpu.memory_space<vmem>>, %arg2: memref<9x4x8xbf16, #tpu.memory_space<vmem>>, %arg3: memref<1x8xf32, #tpu.memory_space<vmem>>, %arg4: memref<9x8x8xbf16, #tpu.memory_space<vmem>>, %arg5: memref<1x8xf32, #tpu.memory_space<vmem>>, %arg6: memref<4x8xbf16, #tpu.memory_space<vmem>>, %arg7: memref<1x8xf32, #tpu.memory_space<vmem>>, %arg8: memref<1x8x8x8xf32, #tpu.memory_space<vmem>>, %arg9: memref<1x10x10x8xbf16, #tpu.memory_space<vmem>>) attributes {dimension_semantics = [#tpu.dimension_semantics<parallel>], iteration_bounds = array<i64: 2>, scalar_prefetch = 0 : i64, scratch_operands = 1 : i64, tpu.core_type = #tpu.core_type<tc>, window_params = [{transform_indices = @transform_0, window_bounds = array<i64: 4, 1, 9, 9, 4>}, {pipeline_mode = #tpu.pipeline_mode<synchronous>, transform_indices = @transform_1, window_bounds = array<i64: 9, 4, 8>}, {pipeline_mode = #tpu.pipeline_mode<synchronous>, transform_indices = @transform_2, window_bounds = array<i64: 1, 8>}, {pipeline_mode = #tpu.pipeline_mode<synchronous>, transform_indices = @transform_3, window_bounds = array<i64: 9, 8, 8>}, {pipeline_mode = #tpu.pipeline_mode<synchronous>, transform_indices = @transform_4, window_bounds = array<i64: 1, 8>}, {pipeline_mode = #tpu.pipeline_mode<synchronous>, transform_indices = @transform_5, window_bounds = array<i64: 4, 8>}, {pipeline_mode = #tpu.pipeline_mode<synchronous>, transform_indices = @transform_6, window_bounds = array<i64: 1, 8>}, {transform_indices = @transform_7, window_bounds = array<i64: 1, 8, 8, 8>}]} {
    %c0 = arith.constant 0 : index
    %c0_0 = arith.constant 0 : index
    %c0_1 = arith.constant 0 : index
    %c0_2 = arith.constant 0 : index
    %c0_3 = arith.constant 0 : index
    %0 = vector.load %arg1[%c0, %c0_0, %c0_1, %c0_2, %c0_3] : memref<4x1x9x9x4xbf16, #tpu.memory_space<vmem>>, vector<1x1x9x9x4xbf16>
    %1 = vector.shape_cast %0 : vector<1x1x9x9x4xbf16> to vector<1x9x9x4xbf16>
    %c1 = arith.constant 1 : index
    %c0_4 = arith.constant 0 : index
    %c0_5 = arith.constant 0 : index
    %c0_6 = arith.constant 0 : index
    %c0_7 = arith.constant 0 : index
    %2 = vector.load %arg1[%c1, %c0_4, %c0_5, %c0_6, %c0_7] : memref<4x1x9x9x4xbf16, #tpu.memory_space<vmem>>, vector<1x1x9x9x4xbf16>
    %3 = vector.shape_cast %2 : vector<1x1x9x9x4xbf16> to vector<1x9x9x4xbf16>
    %c2 = arith.constant 2 : index
    %c0_8 = arith.constant 0 : index
    %c0_9 = arith.constant 0 : index
    %c0_10 = arith.constant 0 : index
    %c0_11 = arith.constant 0 : index
    %4 = vector.load %arg1[%c2, %c0_8, %c0_9, %c0_10, %c0_11] : memref<4x1x9x9x4xbf16, #tpu.memory_space<vmem>>, vector<1x1x9x9x4xbf16>
    %5 = vector.shape_cast %4 : vector<1x1x9x9x4xbf16> to vector<1x9x9x4xbf16>
    %c3 = arith.constant 3 : index
    %c0_12 = arith.constant 0 : index
    %c0_13 = arith.constant 0 : index
    %c0_14 = arith.constant 0 : index
    %c0_15 = arith.constant 0 : index
    %6 = vector.load %arg1[%c3, %c0_12, %c0_13, %c0_14, %c0_15] : memref<4x1x9x9x4xbf16, #tpu.memory_space<vmem>>, vector<1x1x9x9x4xbf16>
    %7 = vector.shape_cast %6 : vector<1x1x9x9x4xbf16> to vector<1x9x9x4xbf16>
    %c0_16 = arith.constant 0 : index
    %c0_17 = arith.constant 0 : index
    %8 = vector.load %arg3[%c0_16, %c0_17] : memref<1x8xf32, #tpu.memory_space<vmem>>, vector<1x8xf32>
    %9 = vector.shape_cast %8 : vector<1x8xf32> to vector<1x8xf32>
    %10 = vector.broadcast %9 : vector<1x8xf32> to vector<64x8xf32>
    %11 = vector.extract_strided_slice %1 {offsets = [0, 0, 0, 0], sizes = [1, 8, 8, 4], strides = [1, 1, 1, 1]} : vector<1x9x9x4xbf16> to vector<1x8x8x4xbf16>
    %12 = vector.shape_cast %11 : vector<1x8x8x4xbf16> to vector<64x4xbf16>
    %c0_18 = arith.constant 0 : index
    %c0_19 = arith.constant 0 : index
    %c0_20 = arith.constant 0 : index
    %13 = vector.load %arg2[%c0_18, %c0_19, %c0_20] : memref<9x4x8xbf16, #tpu.memory_space<vmem>>, vector<1x4x8xbf16>
    %14 = vector.shape_cast %13 : vector<1x4x8xbf16> to vector<4x8xbf16>
    %cst = arith.constant dense<0.000000e+00> : vector<64x8xf32>
    %15 = tpu.matmul %12, %14, %cst {dimension_numbers = #tpu.dot_dimension_numbers<[1], [0], [0], [1], [0, 0, 1, 1], [], []>} : vector<64x4xbf16>, vector<4x8xbf16>, vector<64x8xf32> -> vector<64x8xf32>
    %16 = arith.addf %10, %15 : vector<64x8xf32>
    %17 = vector.extract_strided_slice %3 {offsets = [0, 0, 0, 0], sizes = [1, 8, 8, 4], strides = [1, 1, 1, 1]} : vector<1x9x9x4xbf16> to vector<1x8x8x4xbf16>
    %18 = vector.shape_cast %17 : vector<1x8x8x4xbf16> to vector<64x4xbf16>
    %c1_21 = arith.constant 1 : index
    %c0_22 = arith.constant 0 : index
    %c0_23 = arith.constant 0 : index
    %19 = vector.load %arg2[%c1_21, %c0_22, %c0_23] : memref<9x4x8xbf16, #tpu.memory_space<vmem>>, vector<1x4x8xbf16>
    %20 = vector.shape_cast %19 : vector<1x4x8xbf16> to vector<4x8xbf16>
    %cst_24 = arith.constant dense<0.000000e+00> : vector<64x8xf32>
    %21 = tpu.matmul %18, %20, %cst_24 {dimension_numbers = #tpu.dot_dimension_numbers<[1], [0], [0], [1], [0, 0, 1, 1], [], []>} : vector<64x4xbf16>, vector<4x8xbf16>, vector<64x8xf32> -> vector<64x8xf32>
    %22 = arith.addf %16, %21 : vector<64x8xf32>
    %23 = vector.extract_strided_slice %1 {offsets = [0, 0, 1, 0], sizes = [1, 8, 8, 4], strides = [1, 1, 1, 1]} : vector<1x9x9x4xbf16> to vector<1x8x8x4xbf16>
    %24 = vector.shape_cast %23 : vector<1x8x8x4xbf16> to vector<64x4xbf16>
    %c2_25 = arith.constant 2 : index
    %c0_26 = arith.constant 0 : index
    %c0_27 = arith.constant 0 : index
    %25 = vector.load %arg2[%c2_25, %c0_26, %c0_27] : memref<9x4x8xbf16, #tpu.memory_space<vmem>>, vector<1x4x8xbf16>
    %26 = vector.shape_cast %25 : vector<1x4x8xbf16> to vector<4x8xbf16>
    %cst_28 = arith.constant dense<0.000000e+00> : vector<64x8xf32>
    %27 = tpu.matmul %24, %26, %cst_28 {dimension_numbers = #tpu.dot_dimension_numbers<[1], [0], [0], [1], [0, 0, 1, 1], [], []>} : vector<64x4xbf16>, vector<4x8xbf16>, vector<64x8xf32> -> vector<64x8xf32>
    %28 = arith.addf %22, %27 : vector<64x8xf32>
    %29 = vector.extract_strided_slice %5 {offsets = [0, 0, 0, 0], sizes = [1, 8, 8, 4], strides = [1, 1, 1, 1]} : vector<1x9x9x4xbf16> to vector<1x8x8x4xbf16>
    %30 = vector.shape_cast %29 : vector<1x8x8x4xbf16> to vector<64x4xbf16>
    %c3_29 = arith.constant 3 : index
    %c0_30 = arith.constant 0 : index
    %c0_31 = arith.constant 0 : index
    %31 = vector.load %arg2[%c3_29, %c0_30, %c0_31] : memref<9x4x8xbf16, #tpu.memory_space<vmem>>, vector<1x4x8xbf16>
    %32 = vector.shape_cast %31 : vector<1x4x8xbf16> to vector<4x8xbf16>
    %cst_32 = arith.constant dense<0.000000e+00> : vector<64x8xf32>
    %33 = tpu.matmul %30, %32, %cst_32 {dimension_numbers = #tpu.dot_dimension_numbers<[1], [0], [0], [1], [0, 0, 1, 1], [], []>} : vector<64x4xbf16>, vector<4x8xbf16>, vector<64x8xf32> -> vector<64x8xf32>
    %34 = arith.addf %28, %33 : vector<64x8xf32>
    %35 = vector.extract_strided_slice %7 {offsets = [0, 0, 0, 0], sizes = [1, 8, 8, 4], strides = [1, 1, 1, 1]} : vector<1x9x9x4xbf16> to vector<1x8x8x4xbf16>
    %36 = vector.shape_cast %35 : vector<1x8x8x4xbf16> to vector<64x4xbf16>
    %c4 = arith.constant 4 : index
    %c0_33 = arith.constant 0 : index
    %c0_34 = arith.constant 0 : index
    %37 = vector.load %arg2[%c4, %c0_33, %c0_34] : memref<9x4x8xbf16, #tpu.memory_space<vmem>>, vector<1x4x8xbf16>
    %38 = vector.shape_cast %37 : vector<1x4x8xbf16> to vector<4x8xbf16>
    %cst_35 = arith.constant dense<0.000000e+00> : vector<64x8xf32>
    %39 = tpu.matmul %36, %38, %cst_35 {dimension_numbers = #tpu.dot_dimension_numbers<[1], [0], [0], [1], [0, 0, 1, 1], [], []>} : vector<64x4xbf16>, vector<4x8xbf16>, vector<64x8xf32> -> vector<64x8xf32>
    %40 = arith.addf %34, %39 : vector<64x8xf32>
    %41 = vector.extract_strided_slice %5 {offsets = [0, 0, 1, 0], sizes = [1, 8, 8, 4], strides = [1, 1, 1, 1]} : vector<1x9x9x4xbf16> to vector<1x8x8x4xbf16>
    %42 = vector.shape_cast %41 : vector<1x8x8x4xbf16> to vector<64x4xbf16>
    %c5 = arith.constant 5 : index
    %c0_36 = arith.constant 0 : index
    %c0_37 = arith.constant 0 : index
    %43 = vector.load %arg2[%c5, %c0_36, %c0_37] : memref<9x4x8xbf16, #tpu.memory_space<vmem>>, vector<1x4x8xbf16>
    %44 = vector.shape_cast %43 : vector<1x4x8xbf16> to vector<4x8xbf16>
    %cst_38 = arith.constant dense<0.000000e+00> : vector<64x8xf32>
    %45 = tpu.matmul %42, %44, %cst_38 {dimension_numbers = #tpu.dot_dimension_numbers<[1], [0], [0], [1], [0, 0, 1, 1], [], []>} : vector<64x4xbf16>, vector<4x8xbf16>, vector<64x8xf32> -> vector<64x8xf32>
    %46 = arith.addf %40, %45 : vector<64x8xf32>
    %47 = vector.extract_strided_slice %1 {offsets = [0, 1, 0, 0], sizes = [1, 8, 8, 4], strides = [1, 1, 1, 1]} : vector<1x9x9x4xbf16> to vector<1x8x8x4xbf16>
    %48 = vector.shape_cast %47 : vector<1x8x8x4xbf16> to vector<64x4xbf16>
    %c6 = arith.constant 6 : index
    %c0_39 = arith.constant 0 : index
    %c0_40 = arith.constant 0 : index
    %49 = vector.load %arg2[%c6, %c0_39, %c0_40] : memref<9x4x8xbf16, #tpu.memory_space<vmem>>, vector<1x4x8xbf16>
    %50 = vector.shape_cast %49 : vector<1x4x8xbf16> to vector<4x8xbf16>
    %cst_41 = arith.constant dense<0.000000e+00> : vector<64x8xf32>
    %51 = tpu.matmul %48, %50, %cst_41 {dimension_numbers = #tpu.dot_dimension_numbers<[1], [0], [0], [1], [0, 0, 1, 1], [], []>} : vector<64x4xbf16>, vector<4x8xbf16>, vector<64x8xf32> -> vector<64x8xf32>
    %52 = arith.addf %46, %51 : vector<64x8xf32>
    %53 = vector.extract_strided_slice %3 {offsets = [0, 1, 0, 0], sizes = [1, 8, 8, 4], strides = [1, 1, 1, 1]} : vector<1x9x9x4xbf16> to vector<1x8x8x4xbf16>
    %54 = vector.shape_cast %53 : vector<1x8x8x4xbf16> to vector<64x4xbf16>
    %c7 = arith.constant 7 : index
    %c0_42 = arith.constant 0 : index
    %c0_43 = arith.constant 0 : index
    %55 = vector.load %arg2[%c7, %c0_42, %c0_43] : memref<9x4x8xbf16, #tpu.memory_space<vmem>>, vector<1x4x8xbf16>
    %56 = vector.shape_cast %55 : vector<1x4x8xbf16> to vector<4x8xbf16>
    %cst_44 = arith.constant dense<0.000000e+00> : vector<64x8xf32>
    %57 = tpu.matmul %54, %56, %cst_44 {dimension_numbers = #tpu.dot_dimension_numbers<[1], [0], [0], [1], [0, 0, 1, 1], [], []>} : vector<64x4xbf16>, vector<4x8xbf16>, vector<64x8xf32> -> vector<64x8xf32>
    %58 = arith.addf %52, %57 : vector<64x8xf32>
    %59 = vector.extract_strided_slice %1 {offsets = [0, 1, 1, 0], sizes = [1, 8, 8, 4], strides = [1, 1, 1, 1]} : vector<1x9x9x4xbf16> to vector<1x8x8x4xbf16>
    %60 = vector.shape_cast %59 : vector<1x8x8x4xbf16> to vector<64x4xbf16>
    %c8 = arith.constant 8 : index
    %c0_45 = arith.constant 0 : index
    %c0_46 = arith.constant 0 : index
    %61 = vector.load %arg2[%c8, %c0_45, %c0_46] : memref<9x4x8xbf16, #tpu.memory_space<vmem>>, vector<1x4x8xbf16>
    %62 = vector.shape_cast %61 : vector<1x4x8xbf16> to vector<4x8xbf16>
    %cst_47 = arith.constant dense<0.000000e+00> : vector<64x8xf32>
    %63 = tpu.matmul %60, %62, %cst_47 {dimension_numbers = #tpu.dot_dimension_numbers<[1], [0], [0], [1], [0, 0, 1, 1], [], []>} : vector<64x4xbf16>, vector<4x8xbf16>, vector<64x8xf32> -> vector<64x8xf32>
    %64 = arith.addf %58, %63 : vector<64x8xf32>
    %cst_48 = arith.constant 0.000000e+00 : f32
    %65 = vector.broadcast %cst_48 : f32 to vector<64x8xf32>
    %66 = arith.maximumf %64, %65 : vector<64x8xf32>
    %67 = arith.truncf %66 : vector<64x8xf32> to vector<64x8xbf16>
    %cst_49 = arith.constant 0.000000e+00 : bf16
    %68 = vector.broadcast %cst_49 : bf16 to vector<1x10x10x8xbf16>
    %c0_50 = arith.constant 0 : index
    %c0_51 = arith.constant 0 : index
    %c0_52 = arith.constant 0 : index
    %c0_53 = arith.constant 0 : index
    %69 = vector.load %arg9[%c0_50, %c0_51, %c0_52, %c0_53] : memref<1x10x10x8xbf16, #tpu.memory_space<vmem>>, vector<1x10x10x8xbf16>
    tpu.vector_store %arg9[%c0_50, %c0_51, %c0_52, %c0_53], %68 {strides = array<i32>} : memref<1x10x10x8xbf16, #tpu.memory_space<vmem>>, vector<1x10x10x8xbf16>,
    %70 = vector.shape_cast %67 : vector<64x8xbf16> to vector<1x8x8x8xbf16>
    %c0_54 = arith.constant 0 : index
    %c1_55 = arith.constant 1 : index
    %c1_56 = arith.constant 1 : index
    %c0_57 = arith.constant 0 : index
    %71 = vector.load %arg9[%c0_54, %c1_55, %c1_56, %c0_57] : memref<1x10x10x8xbf16, #tpu.memory_space<vmem>>, vector<1x8x8x8xbf16>
    tpu.vector_store %arg9[%c0_54, %c1_55, %c1_56, %c0_57], %70 {strides = array<i32>} : memref<1x10x10x8xbf16, #tpu.memory_space<vmem>>, vector<1x8x8x8xbf16>,
    %c0_58 = arith.constant 0 : index
    %c0_59 = arith.constant 0 : index
    %72 = vector.load %arg5[%c0_58, %c0_59] : memref<1x8xf32, #tpu.memory_space<vmem>>, vector<1x8xf32>
    %73 = vector.shape_cast %72 : vector<1x8xf32> to vector<1x8xf32>
    %74 = vector.broadcast %73 : vector<1x8xf32> to vector<64x8xf32>
    %c0_60 = arith.constant 0 : index
    %c0_61 = arith.constant 0 : index
    %c0_62 = arith.constant 0 : index
    %c0_63 = arith.constant 0 : index
    %75 = vector.load %arg9[%c0_60, %c0_61, %c0_62, %c0_63] : memref<1x10x10x8xbf16, #tpu.memory_space<vmem>>, vector<1x10x10x8xbf16>
    %76 = vector.extract_strided_slice %75 {offsets = [0, 0, 0, 0], sizes = [1, 8, 8, 8], strides = [1, 1, 1, 1]} : vector<1x10x10x8xbf16> to vector<1x8x8x8xbf16>
    %77 = vector.shape_cast %76 : vector<1x8x8x8xbf16> to vector<64x8xbf16>
    %c0_64 = arith.constant 0 : index
    %c0_65 = arith.constant 0 : index
    %c0_66 = arith.constant 0 : index
    %78 = vector.load %arg4[%c0_64, %c0_65, %c0_66] : memref<9x8x8xbf16, #tpu.memory_space<vmem>>, vector<1x8x8xbf16>
    %79 = vector.shape_cast %78 : vector<1x8x8xbf16> to vector<8x8xbf16>
    %cst_67 = arith.constant dense<0.000000e+00> : vector<64x8xf32>
    %80 = tpu.matmul %77, %79, %cst_67 {dimension_numbers = #tpu.dot_dimension_numbers<[1], [0], [0], [1], [0, 0, 1, 1], [], []>} : vector<64x8xbf16>, vector<8x8xbf16>, vector<64x8xf32> -> vector<64x8xf32>
    %81 = arith.addf %74, %80 : vector<64x8xf32>
    %82 = vector.extract_strided_slice %75 {offsets = [0, 0, 1, 0], sizes = [1, 8, 8, 8], strides = [1, 1, 1, 1]} : vector<1x10x10x8xbf16> to vector<1x8x8x8xbf16>
    %83 = vector.shape_cast %82 : vector<1x8x8x8xbf16> to vector<64x8xbf16>
    %c1_68 = arith.constant 1 : index
    %c0_69 = arith.constant 0 : index
    %c0_70 = arith.constant 0 : index
    %84 = vector.load %arg4[%c1_68, %c0_69, %c0_70] : memref<9x8x8xbf16, #tpu.memory_space<vmem>>, vector<1x8x8xbf16>
    %85 = vector.shape_cast %84 : vector<1x8x8xbf16> to vector<8x8xbf16>
    %cst_71 = arith.constant dense<0.000000e+00> : vector<64x8xf32>
    %86 = tpu.matmul %83, %85, %cst_71 {dimension_numbers = #tpu.dot_dimension_numbers<[1], [0], [0], [1], [0, 0, 1, 1], [], []>} : vector<64x8xbf16>, vector<8x8xbf16>, vector<64x8xf32> -> vector<64x8xf32>
    %87 = arith.addf %81, %86 : vector<64x8xf32>
    %88 = vector.extract_strided_slice %75 {offsets = [0, 0, 2, 0], sizes = [1, 8, 8, 8], strides = [1, 1, 1, 1]} : vector<1x10x10x8xbf16> to vector<1x8x8x8xbf16>
    %89 = vector.shape_cast %88 : vector<1x8x8x8xbf16> to vector<64x8xbf16>
    %c2_72 = arith.constant 2 : index
    %c0_73 = arith.constant 0 : index
    %c0_74 = arith.constant 0 : index
    %90 = vector.load %arg4[%c2_72, %c0_73, %c0_74] : memref<9x8x8xbf16, #tpu.memory_space<vmem>>, vector<1x8x8xbf16>
    %91 = vector.shape_cast %90 : vector<1x8x8xbf16> to vector<8x8xbf16>
    %cst_75 = arith.constant dense<0.000000e+00> : vector<64x8xf32>
    %92 = tpu.matmul %89, %91, %cst_75 {dimension_numbers = #tpu.dot_dimension_numbers<[1], [0], [0], [1], [0, 0, 1, 1], [], []>} : vector<64x8xbf16>, vector<8x8xbf16>, vector<64x8xf32> -> vector<64x8xf32>
    %93 = arith.addf %87, %92 : vector<64x8xf32>
    %94 = vector.extract_strided_slice %75 {offsets = [0, 1, 0, 0], sizes = [1, 8, 8, 8], strides = [1, 1, 1, 1]} : vector<1x10x10x8xbf16> to vector<1x8x8x8xbf16>
    %95 = vector.shape_cast %94 : vector<1x8x8x8xbf16> to vector<64x8xbf16>
    %c3_76 = arith.constant 3 : index
    %c0_77 = arith.constant 0 : index
    %c0_78 = arith.constant 0 : index
    %96 = vector.load %arg4[%c3_76, %c0_77, %c0_78] : memref<9x8x8xbf16, #tpu.memory_space<vmem>>, vector<1x8x8xbf16>
    %97 = vector.shape_cast %96 : vector<1x8x8xbf16> to vector<8x8xbf16>
    %cst_79 = arith.constant dense<0.000000e+00> : vector<64x8xf32>
    %98 = tpu.matmul %95, %97, %cst_79 {dimension_numbers = #tpu.dot_dimension_numbers<[1], [0], [0], [1], [0, 0, 1, 1], [], []>} : vector<64x8xbf16>, vector<8x8xbf16>, vector<64x8xf32> -> vector<64x8xf32>
    %99 = arith.addf %93, %98 : vector<64x8xf32>
    %100 = vector.extract_strided_slice %75 {offsets = [0, 1, 1, 0], sizes = [1, 8, 8, 8], strides = [1, 1, 1, 1]} : vector<1x10x10x8xbf16> to vector<1x8x8x8xbf16>
    %101 = vector.shape_cast %100 : vector<1x8x8x8xbf16> to vector<64x8xbf16>
    %c4_80 = arith.constant 4 : index
    %c0_81 = arith.constant 0 : index
    %c0_82 = arith.constant 0 : index
    %102 = vector.load %arg4[%c4_80, %c0_81, %c0_82] : memref<9x8x8xbf16, #tpu.memory_space<vmem>>, vector<1x8x8xbf16>
    %103 = vector.shape_cast %102 : vector<1x8x8xbf16> to vector<8x8xbf16>
    %cst_83 = arith.constant dense<0.000000e+00> : vector<64x8xf32>
    %104 = tpu.matmul %101, %103, %cst_83 {dimension_numbers = #tpu.dot_dimension_numbers<[1], [0], [0], [1], [0, 0, 1, 1], [], []>} : vector<64x8xbf16>, vector<8x8xbf16>, vector<64x8xf32> -> vector<64x8xf32>
    %105 = arith.addf %99, %104 : vector<64x8xf32>
    %106 = vector.extract_strided_slice %75 {offsets = [0, 1, 2, 0], sizes = [1, 8, 8, 8], strides = [1, 1, 1, 1]} : vector<1x10x10x8xbf16> to vector<1x8x8x8xbf16>
    %107 = vector.shape_cast %106 : vector<1x8x8x8xbf16> to vector<64x8xbf16>
    %c5_84 = arith.constant 5 : index
    %c0_85 = arith.constant 0 : index
    %c0_86 = arith.constant 0 : index
    %108 = vector.load %arg4[%c5_84, %c0_85, %c0_86] : memref<9x8x8xbf16, #tpu.memory_space<vmem>>, vector<1x8x8xbf16>
    %109 = vector.shape_cast %108 : vector<1x8x8xbf16> to vector<8x8xbf16>
    %cst_87 = arith.constant dense<0.000000e+00> : vector<64x8xf32>
    %110 = tpu.matmul %107, %109, %cst_87 {dimension_numbers = #tpu.dot_dimension_numbers<[1], [0], [0], [1], [0, 0, 1, 1], [], []>} : vector<64x8xbf16>, vector<8x8xbf16>, vector<64x8xf32> -> vector<64x8xf32>
    %111 = arith.addf %105, %110 : vector<64x8xf32>
    %112 = vector.extract_strided_slice %75 {offsets = [0, 2, 0, 0], sizes = [1, 8, 8, 8], strides = [1, 1, 1, 1]} : vector<1x10x10x8xbf16> to vector<1x8x8x8xbf16>
    %113 = vector.shape_cast %112 : vector<1x8x8x8xbf16> to vector<64x8xbf16>
    %c6_88 = arith.constant 6 : index
    %c0_89 = arith.constant 0 : index
    %c0_90 = arith.constant 0 : index
    %114 = vector.load %arg4[%c6_88, %c0_89, %c0_90] : memref<9x8x8xbf16, #tpu.memory_space<vmem>>, vector<1x8x8xbf16>
    %115 = vector.shape_cast %114 : vector<1x8x8xbf16> to vector<8x8xbf16>
    %cst_91 = arith.constant dense<0.000000e+00> : vector<64x8xf32>
    %116 = tpu.matmul %113, %115, %cst_91 {dimension_numbers = #tpu.dot_dimension_numbers<[1], [0], [0], [1], [0, 0, 1, 1], [], []>} : vector<64x8xbf16>, vector<8x8xbf16>, vector<64x8xf32> -> vector<64x8xf32>
    %117 = arith.addf %111, %116 : vector<64x8xf32>
    %118 = vector.extract_strided_slice %75 {offsets = [0, 2, 1, 0], sizes = [1, 8, 8, 8], strides = [1, 1, 1, 1]} : vector<1x10x10x8xbf16> to vector<1x8x8x8xbf16>
    %119 = vector.shape_cast %118 : vector<1x8x8x8xbf16> to vector<64x8xbf16>
    %c7_92 = arith.constant 7 : index
    %c0_93 = arith.constant 0 : index
    %c0_94 = arith.constant 0 : index
    %120 = vector.load %arg4[%c7_92, %c0_93, %c0_94] : memref<9x8x8xbf16, #tpu.memory_space<vmem>>, vector<1x8x8xbf16>
    %121 = vector.shape_cast %120 : vector<1x8x8xbf16> to vector<8x8xbf16>
    %cst_95 = arith.constant dense<0.000000e+00> : vector<64x8xf32>
    %122 = tpu.matmul %119, %121, %cst_95 {dimension_numbers = #tpu.dot_dimension_numbers<[1], [0], [0], [1], [0, 0, 1, 1], [], []>} : vector<64x8xbf16>, vector<8x8xbf16>, vector<64x8xf32> -> vector<64x8xf32>
    %123 = arith.addf %117, %122 : vector<64x8xf32>
    %124 = vector.extract_strided_slice %75 {offsets = [0, 2, 2, 0], sizes = [1, 8, 8, 8], strides = [1, 1, 1, 1]} : vector<1x10x10x8xbf16> to vector<1x8x8x8xbf16>
    %125 = vector.shape_cast %124 : vector<1x8x8x8xbf16> to vector<64x8xbf16>
    %c8_96 = arith.constant 8 : index
    %c0_97 = arith.constant 0 : index
    %c0_98 = arith.constant 0 : index
    %126 = vector.load %arg4[%c8_96, %c0_97, %c0_98] : memref<9x8x8xbf16, #tpu.memory_space<vmem>>, vector<1x8x8xbf16>
    %127 = vector.shape_cast %126 : vector<1x8x8xbf16> to vector<8x8xbf16>
    %cst_99 = arith.constant dense<0.000000e+00> : vector<64x8xf32>
    %128 = tpu.matmul %125, %127, %cst_99 {dimension_numbers = #tpu.dot_dimension_numbers<[1], [0], [0], [1], [0, 0, 1, 1], [], []>} : vector<64x8xbf16>, vector<8x8xbf16>, vector<64x8xf32> -> vector<64x8xf32>
    %129 = arith.addf %123, %128 : vector<64x8xf32>
    %130 = vector.extract_strided_slice %7 {offsets = [0, 0, 0, 0], sizes = [1, 8, 8, 4], strides = [1, 1, 1, 1]} : vector<1x9x9x4xbf16> to vector<1x8x8x4xbf16>
    %131 = vector.shape_cast %130 : vector<1x8x8x4xbf16> to vector<64x4xbf16>
    %c0_100 = arith.constant 0 : index
    %c0_101 = arith.constant 0 : index
    %132 = vector.load %arg6[%c0_100, %c0_101] : memref<4x8xbf16, #tpu.memory_space<vmem>>, vector<4x8xbf16>
    %cst_102 = arith.constant dense<0.000000e+00> : vector<64x8xf32>
    %133 = tpu.matmul %131, %132, %cst_102 {dimension_numbers = #tpu.dot_dimension_numbers<[1], [0], [0], [1], [0, 0, 1, 1], [], []>} : vector<64x4xbf16>, vector<4x8xbf16>, vector<64x8xf32> -> vector<64x8xf32>
    %c0_103 = arith.constant 0 : index
    %c0_104 = arith.constant 0 : index
    %134 = vector.load %arg7[%c0_103, %c0_104] : memref<1x8xf32, #tpu.memory_space<vmem>>, vector<1x8xf32>
    %135 = vector.broadcast %134 : vector<1x8xf32> to vector<64x8xf32>
    %136 = arith.addf %133, %135 : vector<64x8xf32>
    %137 = arith.addf %129, %136 : vector<64x8xf32>
    %138 = vector.shape_cast %137 : vector<64x8xf32> to vector<1x8x8x8xf32>
    %c0_105 = arith.constant 0 : index
    %c0_106 = arith.constant 0 : index
    %c0_107 = arith.constant 0 : index
    %c0_108 = arith.constant 0 : index
    %139 = vector.load %arg8[%c0_105, %c0_106, %c0_107, %c0_108] : memref<1x8x8x8xf32, #tpu.memory_space<vmem>>, vector<1x8x8x8xf32>
    tpu.vector_store %arg8[%c0_105, %c0_106, %c0_107, %c0_108], %138 {strides = array<i32>} : memref<1x8x8x8xf32, #tpu.memory_space<vmem>>, vector<1x8x8x8xf32>,
    return
  }
  func.func @transform_0(%arg0: i32) -> (i32, i32, i32, i32, i32) {
    %c0_i32 = arith.constant 0 : i32
    %c0_i32_0 = arith.constant 0 : i32
    %c0_i32_1 = arith.constant 0 : i32
    %c0_i32_2 = arith.constant 0 : i32
    %c0_i32_3 = arith.constant 0 : i32
    return %c0_i32, %arg0, %c0_i32_0, %c0_i32_1, %c0_i32_2 : i32, i32, i32, i32, i32
  }
  func.func @transform_1(%arg0: i32) -> (i32, i32, i32) {
    %c0_i32 = arith.constant 0 : i32
    %c0_i32_0 = arith.constant 0 : i32
    %c0_i32_1 = arith.constant 0 : i32
    %c0_i32_2 = arith.constant 0 : i32
    return %c0_i32, %c0_i32_0, %c0_i32_1 : i32, i32, i32
  }
  func.func @transform_2(%arg0: i32) -> (i32, i32) {
    %c0_i32 = arith.constant 0 : i32
    %c0_i32_0 = arith.constant 0 : i32
    %c0_i32_1 = arith.constant 0 : i32
    return %c0_i32, %c0_i32_0 : i32, i32
  }
  func.func @transform_3(%arg0: i32) -> (i32, i32, i32) {
    %c0_i32 = arith.constant 0 : i32
    %c0_i32_0 = arith.constant 0 : i32
    %c0_i32_1 = arith.constant 0 : i32
    %c0_i32_2 = arith.constant 0 : i32
    return %c0_i32, %c0_i32_0, %c0_i32_1 : i32, i32, i32
  }
  func.func @transform_4(%arg0: i32) -> (i32, i32) {
    %c0_i32 = arith.constant 0 : i32
    %c0_i32_0 = arith.constant 0 : i32
    %c0_i32_1 = arith.constant 0 : i32
    return %c0_i32, %c0_i32_0 : i32, i32
  }
  func.func @transform_5(%arg0: i32) -> (i32, i32) {
    %c0_i32 = arith.constant 0 : i32
    %c0_i32_0 = arith.constant 0 : i32
    %c0_i32_1 = arith.constant 0 : i32
    return %c0_i32, %c0_i32_0 : i32, i32
  }
  func.func @transform_6(%arg0: i32) -> (i32, i32) {
    %c0_i32 = arith.constant 0 : i32
    %c0_i32_0 = arith.constant 0 : i32
    %c0_i32_1 = arith.constant 0 : i32
    return %c0_i32, %c0_i32_0 : i32, i32
  }
  func.func @transform_7(%arg0: i32) -> (i32, i32, i32, i32) {
    %c0_i32 = arith.constant 0 : i32
    %c0_i32_0 = arith.constant 0 : i32
    %c0_i32_1 = arith.constant 0 : i32
    %c0_i32_2 = arith.constant 0 : i32
    return %arg0, %c0_i32, %c0_i32_0, %c0_i32_1 : i32, i32, i32, i32
  }
}

</mosaic_0001>

<bundles_post_ra>
// kernel: res_block_forward.1
= control target key start
LH: loop header
LB: loop body
LE: loop exit
PB: predicated region body
PF: predicated region fallthrough
CT: control target
= control target key end

     0   :  { %s2831_s24 = smov 0   ;;  %s2833_s25 = smov 0   ;;  %s3803_s0 = inlined_call_operand.vmem [shape: bf16[4,2,9,9,4], index: 0, kind: input, shape index: {}]   ;;  %s3804_s1 = inlined_call_operand.vmem [shape: bf16[9,4,8], index: 1, kind: input, shape index: {}]   ;;  %s3805_s2 = inlined_call_operand.vmem [shape: f32[1,8], index: 2, kind: input, shape index: {}]   ;;  %s3806_s3 = inlined_call_operand.vmem [shape: bf16[9,8,8], index: 3, kind: input, shape index: {}]   ;;  %s3807_s4 = inlined_call_operand.vmem [shape: f32[1,8], index: 4, kind: input, shape index: {}]   ;;  %s3808_s5 = inlined_call_operand.vmem [shape: bf16[4,8], index: 5, kind: input, shape index: {}]   ;;  %s3809_s6 = inlined_call_operand.vmem [shape: f32[1,8], index: 6, kind: input, shape index: {}]   ;;  %s3810_s7 = inlined_call_operand.vmem [shape: f32[2,8,8,8], index: 7, kind: output, shape index: {}]  }
   0x1   :  { %s2835_s26 = smov 0  }
   0x2 LB: > { %s2546_s27 = sadd.s32 4294967295, %s2788_s26   ;;  %s2848_s28 = sadd.s32 1, %s2788_s26   ;;  %s2788_s26 = sphi %s2835_s26, %s3821_s26   ;;  %s2784_s25 = sphi %s2833_s25, %s3820_s25   ;;  %s2780_s24 = sphi %s2831_s24, %s3819_s24  }
   0x3   : > { %s21_s29 = ssub.s32 %s2788_s26, %s2848_s28  ;;  %s24_s30 = sadd.s32 1, %s2784_s25 }
   0x4   : > { %p22_p0 = scmp.eq.s32.totalorder %s21_s29, 0  ;;  %p31_p1 = scmp.ne.s32.totalorder %s2784_s25, %s2780_s24 }
   0x5   : > { %p32_p2 = scmp.eq.s32.totalorder %s2788_s26, 0  ;;  %p2549_p4 = scmp.ge.s32.totalorder %s2788_s26, 2 }
   0x6   : > { %s2857_s8 = scalar_select %p22_p0, %s2784_s25, %s24_s30  }
   0x7   : > { %p33_p3 = por %p32_p2, %p31_p1  ;;  %227 = sbr.rel (%p2549_p4) target bundleno = 53 (0x35), region = 40 }
   0xc   : > { %230 = sbr.rel (!%p33_p3) target bundleno = 53 (0x35), region = 44  ;;  %s232_s9 = sand.u32 (%p33_p3), 1, %s2784_s25  }
   0xd   : > { %s2736_s10 = smul.u32 (%p33_p3), 72, %s2788_s26 }
   0xe   : > { %s2735_s11 = smul.u32 (%p33_p3), 288, %s232_s9 }
   0xf   : > { %s2865_s14 = scalar_lea.vmem (%p33_p3), %s3803_s0, %s2736_s10 }
  0x10   : > { %v254_v0 = vld [vmem:[%s2865_s14] sm:$0xff] (%p33_p3)   ;;  %v258_v1 = vld [vmem:[%s2865_s14 + $0x8] sm:$0xff] (%p33_p3)   ;;  %v262_v2 = vld [vmem:[%s2865_s14 + $0x10] sm:$0xff] (%p33_p3)   ;;  %s2870_s15 = scalar_lea.vmem (%p33_p3), [#allocation3], %s2735_s11 }
  0x11   : > { %255 = vst [vmem:[%s2870_s15] sm:$0xff] %v254_v0   ;;  %v266_v3 = vld [vmem:[%s2865_s14 + $0x18] sm:$0xff]   ;;  %v270_v4 = vld [vmem:[%s2865_s14 + $0x20] sm:$0xff]   ;;  %v274_v5 = vld [vmem:[%s2865_s14 + $0x28] sm:$0xff]  }
  0x12   : > { %259 = vst [vmem:[%s2870_s15 + $0x8] sm:$0xff] %v258_v1   ;;  %v278_v6 = vld [vmem:[%s2865_s14 + $0x30] sm:$0xff]   ;;  %v282_v7 = vld [vmem:[%s2865_s14 + $0x38] sm:$0xff]   ;;  %v286_v8 = vld [vmem:[%s2865_s14 + $0x40] sm:$0xff]  }
  0x13   : > { %263 = vst [vmem:[%s2870_s15 + $0x10] sm:$0xff] %v262_v2   ;;  %v290_v9 = vld [vmem:[%s2865_s14 + $0x90] sm:$0xff]   ;;  %v294_v10 = vld [vmem:[%s2865_s14 + $0x98] sm:$0xff]   ;;  %v298_v11 = vld [vmem:[%s2865_s14 + $0xa0] sm:$0xff]  }
  0x14   : > { %267 = vst [vmem:[%s2870_s15 + $0x18] sm:$0xff] %v266_v3   ;;  %v302_v12 = vld [vmem:[%s2865_s14 + $0xa8] sm:$0xff]   ;;  %v306_v13 = vld [vmem:[%s2865_s14 + $0xb0] sm:$0xff]   ;;  %v310_v14 = vld [vmem:[%s2865_s14 + $0xb8] sm:$0xff]  }
  0x15   : > { %271 = vst [vmem:[%s2870_s15 + $0x20] sm:$0xff] %v270_v4   ;;  %v314_v15 = vld [vmem:[%s2865_s14 + $0xc0] sm:$0xff]   ;;  %v318_v16 = vld [vmem:[%s2865_s14 + $0xc8] sm:$0xff]   ;;  %v322_v17 = vld [vmem:[%s2865_s14 + $0xd0] sm:$0xff]  }
  0x16   : > { %275 = vst [vmem:[%s2870_s15 + $0x28] sm:$0xff] %v274_v5   ;;  %v326_v18 = vld [vmem:[%s2865_s14 + $0x120] sm:$0xff]   ;;  %v330_v19 = vld [vmem:[%s2865_s14 + $0x128] sm:$0xff]   ;;  %v334_v20 = vld [vmem:[%s2865_s14 + $0x130] sm:$0xff]  }
  0x17   : > { %279 = vst [vmem:[%s2870_s15 + $0x30] sm:$0xff] %v278_v6   ;;  %v338_v21 = vld [vmem:[%s2865_s14 + $0x138] sm:$0xff]   ;;  %v342_v22 = vld [vmem:[%s2865_s14 + $0x140] sm:$0xff]   ;;  %v346_v23 = vld [vmem:[%s2865_s14 + $0x148] sm:$0xff]  }
  0x18   : > { %283 = vst [vmem:[%s2870_s15 + $0x38] sm:$0xff] %v282_v7   ;;  %v350_v24 = vld [vmem:[%s2865_s14 + $0x150] sm:$0xff]   ;;  %v354_v25 = vld [vmem:[%s2865_s14 + $0x158] sm:$0xff]   ;;  %v358_v26 = vld [vmem:[%s2865_s14 + $0x160] sm:$0xff]  }
  0x19   : > { %287 = vst [vmem:[%s2870_s15 + $0x40] sm:$0xff] %v286_v8   ;;  %v362_v27 = vld [vmem:[%s2865_s14 + $0x1b0] sm:$0xff]   ;;  %v366_v28 = vld [vmem:[%s2865_s14 + $0x1b8] sm:$0xff]   ;;  %v370_v29 = vld [vmem:[%s2865_s14 + $0x1c0] sm:$0xff]  }
  0x1a   : > { %291 = vst [vmem:[%s2870_s15 + $0x48] sm:$0xff] %v290_v9   ;;  %v374_v30 = vld [vmem:[%s2865_s14 + $0x1c8] sm:$0xff]   ;;  %v378_v31 = vld [vmem:[%s2865_s14 + $0x1d0] sm:$0xff]   ;;  %v382_v32 = vld [vmem:[%s2865_s14 + $0x1d8] sm:$0xff]  }
  0x1b   : > { %295 = vst [vmem:[%s2870_s15 + $0x50] sm:$0xff] %v294_v10   ;;  %v386_v33 = vld [vmem:[%s2865_s14 + $0x1e0] sm:$0xff]   ;;  %v390_v34 = vld [vmem:[%s2865_s14 + $0x1e8] sm:$0xff]   ;;  %v394_v35 = vld [vmem:[%s2865_s14 + $0x1f0] sm:$0xff]  }
  0x1c   : > { %299 = vst [vmem:[%s2870_s15 + $0x58] sm:$0xff] %v298_v11  }
  0x1d   : > { %303 = vst [vmem:[%s2870_s15 + $0x60] sm:$0xff] %v302_v12  }
  0x1e   : > { %307 = vst [vmem:[%s2870_s15 + $0x68] sm:$0xff] %v306_v13  }
  0x1f   : > { %311 = vst [vmem:[%s2870_s15 + $0x70] sm:$0xff] %v310_v14  }
  0x20   : > { %315 = vst [vmem:[%s2870_s15 + $0x78] sm:$0xff] %v314_v15  }
  0x21   : > { %319 = vst [vmem:[%s2870_s15 + $0x80] sm:$0xff] %v318_v16  }
  0x22   : > { %323 = vst [vmem:[%s2870_s15 + $0x88] sm:$0xff] %v322_v17  }
  0x23   : > { %327 = vst [vmem:[%s2870_s15 + $0x90] sm:$0xff] %v326_v18  }
  0x24   : > { %331 = vst [vmem:[%s2870_s15 + $0x98] sm:$0xff] %v330_v19  }
  0x25   : > { %335 = vst [vmem:[%s2870_s15 + $0xa0] sm:$0xff] %v334_v20  }
  0x26   : > { %339 = vst [vmem:[%s2870_s15 + $0xa8] sm:$0xff] %v338_v21  }
  0x27   : > { %343 = vst [vmem:[%s2870_s15 + $0xb0] sm:$0xff] %v342_v22  }
  0x28   : > { %347 = vst [vmem:[%s2870_s15 + $0xb8] sm:$0xff] %v346_v23  }
  0x29   : > { %351 = vst [vmem:[%s2870_s15 + $0xc0] sm:$0xff] %v350_v24  }
  0x2a   : > { %355 = vst [vmem:[%s2870_s15 + $0xc8] sm:$0xff] %v354_v25  }
  0x2b   : > { %359 = vst [vmem:[%s2870_s15 + $0xd0] sm:$0xff] %v358_v26  }
  0x2c   : > { %363 = vst [vmem:[%s2870_s15 + $0xd8] sm:$0xff] %v362_v27  }
  0x2d   : > { %367 = vst [vmem:[%s2870_s15 + $0xe0] sm:$0xff] %v366_v28  }
  0x2e   : > { %371 = vst [vmem:[%s2870_s15 + $0xe8] sm:$0xff] %v370_v29  }
  0x2f   : > { %375 = vst [vmem:[%s2870_s15 + $0xf0] sm:$0xff] %v374_v30  }
  0x30   : > { %379 = vst [vmem:[%s2870_s15 + $0xf8] sm:$0xff] %v378_v31  }
  0x31   : > { %383 = vst [vmem:[%s2870_s15 + $0x100] sm:$0xff] %v382_v32  }
  0x32   : > { %387 = vst [vmem:[%s2870_s15 + $0x108] sm:$0xff] %v386_v33  }
  0x33   : > { %391 = vst [vmem:[%s2870_s15 + $0x110] sm:$0xff] %v390_v34  }
  0x34   : > { %395 = vst [vmem:[%s2870_s15 + $0x118] sm:$0xff] %v394_v35  }
  0x35 PF: > { %p2551_p5 = scmp.ge.s32.totalorder %s2788_s26, 1  ;;  %p564_p6 = scmp.lt.s32.totalorder %s2788_s26, 3 }
  0x37   : > { %p565_p7 = pnand %p2551_p5, %p564_p6 }
  0x38   : > { %s571_s18 = sand.u32 (!%p565_p7), 1, %s2780_s24   ;;  %p602_p8 = scmp.lt.s32.totalorder (!%p565_p7), %s2546_s27, 1 }
  0x39   : > { %568 = sbr.rel (%p565_p7) target bundleno = 673 (0x2a1), region = 85 }
  0x3a   : > { %s2737_s19 = smul.u32 (!%p565_p7), 288, %s571_s18 }
  0x3c   : > { %s2960_s24 = scalar_lea.vmem (!%p565_p7), [#allocation3], %s2737_s19 }
  0x3e   : > { %v666_v36 = vld [vmem:[%s3804_s1] sm:$0x3]  ;;  %vm700_vm0 = vcmask 1041408   ;;  %v2601_v38 = vld [vmem:[%s3804_s1 + $0x6] sm:$0x3]  ;;  %vm687_vm1 = vcmask 31744  }
  0x3f   : > { %v702_v37 = vsel %vm700_vm0, %v666_v36, 0  ;;  %v2591_v39 = vld [vmem:[%s3804_s1 + $0x2] sm:$0x3]  ;;  %v1031_v40 = vsel %vm700_vm0, %v2601_v38, 0  ;;  %v2596_v42 = vld [vmem:[%s3804_s1 + $0x4] sm:$0x3] }
  0x40   : > { %711 = vmatpush.bf16.msra.mxu0 %v702_v37  ;;  %2732 = vmatpush.bf16.msra.mxu3 %v702_v37  ;;  %v776_v41 = vsel %vm700_vm0, %v2591_v39, 0  ;;  %v957_v43 = vsel %vm700_vm0, %v2596_v42, 0  ;;  %v608_v44 = vld [vmem:[%s2960_s24] sm:$0xf]  ;;  %v2964_v45 = vld [vmem:[%s2960_s24 + $0x8] sm:$0xf] }
  0x41   : > { %2733 = vmatpush.bf16.msra.mxu1 %v776_v41  ;;  %v2967_v46 = vld [vmem:[%s2960_s24 + $0x10] sm:$0xf]  ;;  %2734 = vmatpush.bf16.msra.mxu2 %v957_v43  ;;  %v675_v47 = vunpack.c.l.b16 %v608_v44  ;;  %v676_v48 = vunpack.c.l.b16 %v2964_v45  ;;  %v2971_v49 = vld [vmem:[%s2960_s24 + $0x18] sm:$0xf]  ;;  %vm815_vm2 = vsmask.f32 3328 }
  0x42   : > { %v833_v50 = vshrl.u32 %v2964_v45, 16  ;;  %v836_v51 = vshll.u32 %v2964_v45, 16  ;;  %v677_v52 = vunpack.c.l.b16 %v2967_v46  ;;  %v678_v53 = vunpack.c.l.b16 %v2971_v49  ;;  %v2981_v57 = vld [vmem:[%s2960_s24 + $0x50] sm:$0xf]  ;;  %v2556_v58 = vld [vmem:[%s2960_s24 + $0x58] sm:$0xf] }
  0x43   : > { %v683_v54 = vpack.c.b16 %v676_v48, %v675_v47  ;;  %v819_v55 = vshrl.u32 %v608_v44, 16  ;;  %v847_v56 = vshrl.u32 %v2967_v46, 16  ;;  %v850_v62 = vshll.u32 %v2967_v46, 16  ;;  %v2990_v63 = vld [vmem:[%s2960_s24 + $0x60] sm:$0xf]  ;;  %s3823_s27 = smov (!%p602_p8, %s2546_s27), 1 }
  0x44   : > { %1040 = vmatpush.bf16.msrb.mxu3 %v1031_v40  ;;  %785 = vmatpush.bf16.msrb.mxu0 %v776_v41  ;;  %v835_v59 = vrot.slane %v833_v50, 4  ;;  %v838_v60 = vrot.slane %v836_v51, 5  ;;  %v684_v61 = vpack.c.b16 %v678_v53, %v677_v52  ;;  %v822_v0 = vshll.u32 %v608_v44, 16  ;;  %v611_v4 = vld [vmem:[%s2960_s24 + $0xc] sm:$0x1]  ;;  %s2723_s9 = sshll.u32 %s3823_s27, 6 }
  0x45   : > { %2587 = vmatmul.msk.bf16.vlgmr.msra.gmra.mxu0 %vm687_vm1, %v683_v54  ;;  %v849_v1 = vrot.slane %v847_v56, 4  ;;  %v861_v2 = vshrl.u32 %v2971_v49, 16  ;;  %v864_v3 = vshll.u32 %v2971_v49, 16  ;;  %v852_v6 = vrot.slane %v850_v62, 5  ;;  %v613_v9 = vld [vmem:[%s2960_s24 + $0x14] sm:$0x1]  ;;  %s3746_s26 = scalar_lea.vmem %s3810_s7, %s2723_s9 }
  0x46   : > { %v839_v5 = vor.u32 %v838_v60, %v835_v59  ;;  %2588 = vmatmul.msk.bf16.vlgmr.msra.gmra.mxu3 %vm687_vm1, %v684_v61  ;;  %v752_v7 = vunpack.c.l.b16 %v2981_v57  ;;  %v753_v8 = vunpack.c.l.b16 %v2556_v58  ;;  %v615_v10 = vld [vmem:[%s2960_s24 + $0x1c] sm:$0x1]  ;;  %v754_v13 = vunpack.c.l.b16 %v2990_v63  ;;  %v3004_v18 = vld [vmem:[%s2960_s24 + $0x20] sm:$0xf]  ;;  %v3009_v23 = vld [vmem:[%s2960_s24 + $0x28] sm:$0xf] }
  0x47   : > { %v863_v11 = vrot.slane %v861_v2, 4  ;;  %v866_v12 = vrot.slane %v864_v3, 5  ;;  %vm816_vm3 = vsmask.f32 7440  ;;  %v842_v16 = vshll.u32 %v611_v4, 16 }
  0x48   : > { %966 = vmatpush.bf16.msra.mxu0 %v957_v43  ;;  %v840_v14 = vrot.slane %v839_v5, 4  ;;  %v3001_v15 = vpack.c.b16 %v753_v8, %v752_v7  ;;  %v853_v17 = vor.u32 %v852_v6, %v849_v1  ;;  %v760_v19 = vpack.c.b16 %v754_v13, %v753_v8  ;;  %vm3012_vm4 = vmor %vm815_vm2, %vm816_vm3  ;;  %v2554_v37 = vld [vmem:[%s2960_s24 + $0x48] sm:$0xf]  ;;  %v617_v42 = vld [vmem:[%s2960_s24 + $0x24] sm:$0x1] }
  0x49   : > { %v856_v20 = vshll.u32 %v613_v9, 16  ;;  %v867_v21 = vor.u32 %v866_v12, %v863_v11  ;;  %v870_v22 = vshll.u32 %v615_v10, 16  ;;  %v821_v24 = vrot.slane %v819_v55, 4  ;;  %v619_v51 = vld [vmem:[%s2960_s24 + $0x2c] sm:$0x1] }
  0x4a   : > { %v824_v25 = vrot.slane %v822_v0, 5  ;;  %v844_v27 = vrot.slane %v842_v16, 5  ;;  %v854_v28 = vrot.slane %v853_v17, 4  ;;  %2593 = vmatmul.msk.bf16.vlgmr.msra.gmra.mxu1 %vm687_vm1, %v760_v19  ;;  %v875_v32 = vshrl.u32 %v3004_v18, 16  ;;  %v3043_v59 = vld [vmem:[%s2960_s24 + $0x68] sm:$0xf] }
  0x4b   : > { %v858_v29 = vrot.slane %v856_v20, 5  ;;  %v868_v30 = vrot.slane %v867_v21, 4  ;;  %v872_v31 = vrot.slane %v870_v22, 5  ;;  %v679_v34 = vunpack.c.l.b16 %v3004_v18  ;;  %v3046_v60 = vld [vmem:[%s2960_s24 + $0x70] sm:$0xf] }
  0x4c   : > { %v845_v33 = vsel %vm3012_vm4, %v840_v14, %v844_v27  ;;  %v878_v35 = vshll.u32 %v3004_v18, 16  ;;  %v889_v36 = vshrl.u32 %v3009_v23, 16  ;;  %v680_v40 = vunpack.c.l.b16 %v3009_v23  ;;  %v3054_v8 = vld [vmem:[%s2960_s24 + $0x30] sm:$0xf]  ;;  %v3059_v14 = vld [vmem:[%s2960_s24 + $0x38] sm:$0xf] }
  0x4d   : > { %v859_v38 = vsel %vm3012_vm4, %v854_v28, %v858_v29  ;;  %v873_v39 = vsel %vm3012_vm4, %v868_v30, %v872_v31  ;;  %v877_v41 = vrot.slane %v875_v32, 4  ;;  %v3030_v43 = vunpack.c.l.b16 %v845_v33  ;;  %v2622_v16 = vld [vmem:[%s3804_s1 + $0x8] sm:$0x3]  ;;  %v2653_v32 = vld [vmem:[%s3804_s1 + $0xe] sm:$0x3] }
  0x4e   : > { %v3032_v44 = vunpack.c.l.b16 %v859_v38  ;;  %v3034_v47 = vunpack.c.l.b16 %v873_v39  ;;  %v880_v50 = vrot.slane %v878_v35, 5  ;;  %v891_v54 = vrot.slane %v889_v36, 4  ;;  %v2643_v38 = vld [vmem:[%s3804_s1 + $0xa] sm:$0x3]  ;;  %v625_v63 = vld [vmem:[%s2960_s24 + $0x44] sm:$0x1] }
  0x4f   : > { %v892_v55 = vshll.u32 %v3009_v23, 16  ;;  %v751_v56 = vunpack.c.l.b16 %v2554_v37  ;;  %v884_v62 = vshll.u32 %v617_v42, 16  ;;  %v825_v0 = vor.u32 %v824_v25, %v821_v24  ;;  %v2648_v37 = vld [vmem:[%s3804_s1 + $0xc] sm:$0x3]  ;;  %v2764_v26 = vld [vmem:[%s3807_s4] ss:$0 sm:$0xff] }
  0x50   : > { %v941_v57 = vpack.c.b16 %v3034_v47, %v3032_v44  ;;  %v1459_v58 = vpack.c.b16 %v3032_v44, %v3030_v43  ;;  %v881_v61 = vor.u32 %v880_v50, %v877_v41  ;;  %v898_v3 = vshll.u32 %v619_v51, 16  ;;  %v621_v51 = vld [vmem:[%s2960_s24 + $0x34] sm:$0x1] }
  0x51   : > { %v894_v1 = vrot.slane %v892_v55, 5  ;;  %v759_v2 = vpack.c.b16 %v752_v7, %v751_v56  ;;  %v685_v4 = vpack.c.b16 %v680_v40, %v679_v34  ;;  %v886_v6 = vrot.slane %v884_v62, 5  ;;  %v609_v7 = vld [vmem:[%s2960_s24 + $0x4] sm:$0x1] }
  0x52   : > { %2598 = vmatmul.msk.bf16.vlgmr.msra.gmra.mxu2 %vm687_vm1, %v941_v57  ;;  %v882_v5 = vrot.slane %v881_v61, 4  ;;  %v755_v9 = vunpack.c.l.b16 %v3043_v59  ;;  %v756_v10 = vunpack.c.l.b16 %v3046_v60  ;;  %v900_v12 = vrot.slane %v898_v3, 5  ;;  %v2565_v3 = vld [vmem:[%s2960_s24 + $0x98] sm:$0xf]  ;;  %v2562_v60 = vld [vmem:[%s2960_s24 + $0x88] sm:$0xf] }
  0x53   : > { %v895_v11 = vor.u32 %v894_v1, %v891_v54  ;;  %v826_v17 = vrot.slane %v825_v0, 4  ;;  %v903_v20 = vshrl.u32 %v3054_v8, 16  ;;  %v906_v21 = vshll.u32 %v3054_v8, 16  ;;  %v623_v54 = vld [vmem:[%s2960_s24 + $0x3c] sm:$0x1] }
  0x54   : > { %v887_v22 = vsel %vm3012_vm4, %v882_v5, %v886_v6  ;;  %v917_v24 = vshrl.u32 %v3059_v14, 16  ;;  %v920_v25 = vshll.u32 %v3059_v14, 16  ;;  %v828_v27 = vshll.u32 %v609_v7, 16  ;;  %v3111_v7 = vld [vmem:[%s2960_s24 + $0x80] sm:$0xf] }
  0x55   : > { %2592 = vmatmul.msk.bf16.vlgmr.msrb.gmra.mxu0 %vm687_vm1, %v759_v2  ;;  %v896_v19 = vrot.slane %v895_v11, 4  ;;  %v761_v28 = vpack.c.b16 %v756_v10, %v755_v9  ;;  %v1105_v30 = vsel %vm700_vm0, %v2622_v16, 0  ;;  %v3083_v33 = vunpack.c.l.b16 %v887_v22  ;;  %v2563_v2 = vld [vmem:[%s2960_s24 + $0x90] sm:$0xf]  ;;  %v2658_v16 = vld [vmem:[%s3804_s1 + $0x10] sm:$0x3] }
  0x56   : > { %2589 = vmatmul.msk.bf16.gmra.mxu3 %vm687_vm1, %v685_v4  ;;  %v830_v31 = vrot.slane %v828_v27, 5  ;;  %1114 = vmatpush.bf16.msrb.mxu0 %v1105_v30  ;;  %v905_v35 = vrot.slane %v903_v20, 4  ;;  %v908_v36 = vrot.slane %v906_v21, 5  ;;  %v919_v41 = vrot.slane %v917_v24, 4 }
  0x57   : > { %v901_v29 = vsel %vm3012_vm4, %v896_v19, %v900_v12  ;;  %v922_v42 = vrot.slane %v920_v25, 5  ;;  %v1403_v55 = vsel %vm700_vm0, %v2653_v32, 0  ;;  %v1343_v56 = vsel %vm700_vm0, %v2648_v37, 0  ;;  %v3108_v12 = vld [vmem:[%s2960_s24 + $0x78] sm:$0xf] }
  0x58   : > { %v3091_v39 = vunpack.c.l.b16 %v901_v29  ;;  %v831_v50 = vsel %vm3012_vm4, %v826_v17, %v830_v31  ;;  %1412 = vmatpush.bf16.msra.mxu3 %v1403_v55  ;;  %v1283_v57 = vsel %vm700_vm0, %v2643_v38, 0  ;;  %v681_v61 = vunpack.c.l.b16 %v3054_v8  ;;  %1352 = vmatpush.bf16.msrb.mxu2 %v1343_v56 }
  0x59   : > { %v682_v62 = vunpack.c.l.b16 %v3059_v14  ;;  %v932_v0 = vunpack.c.l.b16 %v831_v50  ;;  %v909_v1 = vor.u32 %v908_v36, %v905_v35  ;;  %1292 = vmatpush.bf16.msrb.mxu1 %v1283_v57  ;;  %v912_v5 = vshll.u32 %v621_v51, 16 }
  0x5a   : > { %2594 = vmatmul.msk.bf16.gmra.mxu1 %vm687_vm1, %v761_v28  ;;  %v942_v4 = vpack.c.b16 %v3091_v39, %v3083_v33  ;;  %v923_v6 = vor.u32 %v922_v42, %v919_v41  ;;  %v926_v11 = vshll.u32 %v623_v54, 16  ;;  %v1145_v17 = vshrl.u32 %v2563_v2, 16  ;;  %v2564_v41 = vld [vmem:[%s2960_s24 + $0x94] sm:$0x1]  ;;  %v2566_v42 = vld [vmem:[%s2960_s24 + $0x9c] sm:$0x1] }
  0x5b   : > { %v1148_v19 = vshll.u32 %v2563_v2, 16  ;;  %v1159_v20 = vshrl.u32 %v2565_v3, 16  ;;  %v1162_v21 = vshll.u32 %v2565_v3, 16  ;;  %v686_v22 = vpack.c.b16 %v682_v62, %v681_v61  ;;  %v2567_v3 = vld [vmem:[%s2960_s24 + $0xa0] sm:$0xf] }
  0x5c   : > { %v940_v24 = vpack.c.b16 %v3030_v43, %v932_v0  ;;  %v910_v25 = vrot.slane %v909_v1, 4  ;;  %v914_v27 = vrot.slane %v912_v5, 5  ;;  %v924_v28 = vrot.slane %v923_v6, 4 }
  0x5d   : > { %v928_v29 = vrot.slane %v926_v11, 5  ;;  %v757_v30 = vunpack.c.l.b16 %v3108_v12  ;;  %v758_v31 = vunpack.c.l.b16 %v3111_v7  ;;  %v1476_v32 = vsel %vm700_vm0, %v2658_v16, 0 }
  0x5e   : > { %v1147_v35 = vrot.slane %v1145_v17, 4  ;;  %v1150_v36 = vrot.slane %v1148_v19, 5  ;;  %v1161_v37 = vrot.slane %v1159_v20, 4  ;;  %v1164_v38 = vrot.slane %v1162_v21, 5  ;;  %v2604_v19 = vld [vmem:[%s2960_s24 + $0x90] sm:$0xf] }
  0x5f   : > { %v915_v50 = vsel %vm3012_vm4, %v910_v25, %v914_v27  ;;  %v929_v51 = vsel %vm3012_vm4, %v924_v28, %v928_v29  ;;  %v762_v54 = vpack.c.b16 %v758_v31, %v757_v30  ;;  %v1154_v56 = vshll.u32 %v2564_v41, 16  ;;  %v2724_v20 = vld [vmem:[%s2960_s24 + $0x94] sm:$0xf0] }
  0x60   : > { %v1151_v55 = vor.u32 %v1150_v36, %v1147_v35  ;;  %v1165_v57 = vor.u32 %v1164_v38, %v1161_v37  ;;  %v1168_v0 = vshll.u32 %v2566_v42, 16  ;;  %v3137_v1 = vunpack.c.l.b16 %v915_v50  ;;  %v2625_v21 = vld [vmem:[%s2960_s24 + $0xd8] sm:$0xf] }
  0x61   : > { %v3139_v2 = vunpack.c.l.b16 %v929_v51  ;;  %v1156_v6 = vrot.slane %v1154_v56, 5  ;;  %v1176_v25 = vshll.u32 %v2567_v3, 16  ;;  %v2605_v35 = vor.u32 %v2724_v20, %v2604_v19  ;;  %v2573_v19 = vld [vmem:[%s2960_s24 + $0xb8] sm:$0xf] }
  0x62   : > { %2599 = vmatmul.msk.bf16.gmra.mxu2 %vm687_vm1, %v942_v4  ;;  %v2569_v4 = vld [vmem:[%s2960_s24 + $0xa8] sm:$0xf]  ;;  %v1152_v5 = vrot.slane %v1151_v55, 4  ;;  %v1166_v11 = vrot.slane %v1165_v57, 4  ;;  %v1170_v16 = vrot.slane %v1168_v0, 5  ;;  %v1326_v20 = vpack.c.b16 %v677_v52, %v676_v48 }
  0x63   : > { %v943_v17 = vpack.c.b16 %v3139_v2, %v3137_v1  ;;  %v1187_v27 = vshrl.u32 %v2569_v4, 16  ;;  %v1190_v28 = vshll.u32 %v2569_v4, 16  ;;  %v1178_v38 = vrot.slane %v1176_v25, 5  ;;  %v2570_v55 = vld [vmem:[%s2960_s24 + $0xac] sm:$0x1] }
  0x64   : > { %v1157_v29 = vsel %vm3012_vm4, %v1152_v5, %v1156_v6  ;;  %v1387_v14 = vpack.c.b16 %v755_v9, %v754_v13  ;;  %v1461_v9 = vpack.c.b16 %v3137_v1, %v3091_v39  ;;  %v1385_v12 = vunpack.c.l.b16 %v2562_v60 }
  0x65   : > { %2597 = vmatmul.msk.bf16.vlgmr.msra.gmra.mxu0 %vm687_vm1, %v940_v24  ;;  %v1173_v24 = vshrl.u32 %v2567_v3, 16  ;;  %v1189_v41 = vrot.slane %v1187_v27, 4  ;;  %v1192_v42 = vrot.slane %v1190_v28, 5  ;;  %v1258_v50 = vunpack.c.l.b16 %v1157_v29  ;;  %v2725_v28 = vld [vmem:[%s2960_s24 + $0xa4] sm:$0xf0] }
  0x66   : > { %2590 = vmatmul.msk.bf16.gmra.mxu3 %vm687_vm1, %v686_v22  ;;  %1485 = vmatpush.bf16.msra.mxu0 %v1476_v32  ;;  %v2728_v22 = vld [vmem:[%s2960_s24 + $0xdc] sm:$0xf0]  ;;  %v1171_v32 = vsel %vm3012_vm4, %v1166_v11, %v1170_v16  ;;  %v1196_v3 = vshll.u32 %v2570_v55, 16  ;;  %vm1746_vm5 = vcmask 1043456   ;;  %vm1531_vm6 = vcmask 60416  }
  0x67   : > { %v3154_v36 = vor.u32 %v2728_v22, %v2625_v21  ;;  %v1175_v37 = vrot.slane %v1173_v24, 4  ;;  %v1259_v51 = vunpack.c.l.b16 %v1171_v32  ;;  %v1193_v0 = vor.u32 %v1192_v42, %v1189_v41  ;;  %v2608_v21 = vld [vmem:[%s2960_s24 + $0xa0] sm:$0xf]  ;;  %v2629_v22 = vld [vmem:[%s2960_s24 + $0xe8] sm:$0xf] }
  0x68   : > { %v1198_v16 = vrot.slane %v1196_v3, 5  ;;  %v2729_v24 = vld [vmem:[%s2960_s24 + $0xec] sm:$0xf0]  ;;  %v2609_v46 = vor.u32 %v2725_v28, %v2608_v21  ;;  %v2730_v21 = vld [vmem:[%s2960_s24 + $0xfc] sm:$0xf0]  ;;  %vm1533_vm7 = vcmask 57344  }
  0x69   : > { %v1179_v56 = vor.u32 %v1178_v38, %v1175_v37  ;;  %v1266_v4 = vpack.c.b16 %v1259_v51, %v1258_v50  ;;  %v1194_v11 = vrot.slane %v1193_v0, 4  ;;  %v1218_v37 = vshll.u32 %v2573_v19, 16  ;;  %v2572_v51 = vld [vmem:[%s2960_s24 + $0xb4] sm:$0x1] }
  0x6a   : > { %2595 = vmatmul.msk.bf16.gmra.mxu1 %vm687_vm1, %v762_v54  ;;  %v2568_v54 = vld [vmem:[%s2960_s24 + $0xa4] sm:$0x1]  ;;  %v3177_v45 = vor.u32 %v2729_v24, %v2629_v22  ;;  %v2612_v22 = vld [vmem:[%s2960_s24 + $0xb0] sm:$0xf]  ;;  %v2726_v24 = vld [vmem:[%s2960_s24 + $0xb4] sm:$0xf0] }
  0x6b   : > { %v1182_v57 = vshll.u32 %v2568_v54, 16  ;;  %v1180_v5 = vrot.slane %v1179_v56, 4  ;;  %v1199_v27 = vsel %vm3012_vm4, %v1194_v11, %v1198_v16  ;;  %v1220_v50 = vrot.slane %v1218_v37, 5  ;;  %v2574_v54 = vld [vmem:[%s2960_s24 + $0xbc] sm:$0x1] }
  0x6c   : > { %v1261_v52 = vunpack.c.l.b16 %v1199_v27  ;;  %v1224_v3 = vshll.u32 %v2574_v54, 16  ;;  %v2575_v16 = vld [vmem:[%s2960_s24 + $0xc0] sm:$0xf]  ;;  %vm1635_vm8 = vsmask.f32 7938  ;;  %vm1973_vm12 = vcmask 1042432  }
  0x6d   : > { %v1184_v6 = vrot.slane %v1182_v57, 5  ;;  %v1210_v57 = vshll.u32 %v2572_v51, 16  ;;  %v1229_v28 = vshrl.u32 %v2575_v16, 16  ;;  %vm1641_vm9 = vsmask.f32 256  ;;  %vm3399_vm10 = vmand %vm1531_vm6, %vm1635_vm8 }
  0x6e   : > { %v1226_v11 = vrot.slane %v1224_v3, 5  ;;  %vm3409_vm11 = vmand %vm1533_vm7, %vm1641_vm9  ;;  %vm1974_vm13 = vcmask 1046532   ;;  %vm1733_vm15 = vcmask 64512  }
  0x6f   : > { %v1185_v25 = vsel %vm3012_vm4, %v1180_v5, %v1184_v6  ;;  %v1212_v5 = vrot.slane %v1210_v57, 5  ;;  %v1231_v37 = vrot.slane %v1229_v28, 4  ;;  %vm3426_vm14 = vmor %vm1973_vm12, %vm1974_vm13 }
  0x70   : > { %v1260_v48 = vunpack.c.l.b16 %v1185_v25 }
  0x72   : > { %2600 = vmatmul.msk.bf16.gmra.mxu2 %vm687_vm1, %v943_v17  ;;  %v2571_v17 = vld [vmem:[%s2960_s24 + $0xb0] sm:$0xf]  ;;  %v1267_v55 = vpack.c.b16 %v1261_v52, %v1260_v48 }
  0x73   : > { %v1201_v29 = vshrl.u32 %v2571_v17, 16  ;;  %v1204_v32 = vshll.u32 %v2571_v17, 16  ;;  %v2577_v17 = vld [vmem:[%s2960_s24 + $0xc8] sm:$0xf] }
  0x75   : > { %2639 = vmatmul.msk.bf16.vlgmr.msrb.gmra.mxu0 %vm687_vm1, %v3154_v36  ;;  %v1203_v38 = vrot.slane %v1201_v29, 4  ;;  %v1206_v41 = vrot.slane %v1204_v32, 5  ;;  %v1232_v29 = vshll.u32 %v2575_v16, 16  ;;  %v1243_v32 = vshrl.u32 %v2577_v17, 16  ;;  %v2727_v16 = vld [vmem:[%s2960_s24 + $0xc4] sm:$0xf0] }
  0x76   : > { %2618 = vmatmul.msk.bf16.vlgmr.msrb.gmra.mxu3 %vm687_vm1, %v2605_v35  ;;  %v1215_v35 = vshrl.u32 %v2573_v19, 16  ;;  %v1327_v19 = vpack.c.b16 %v679_v34, %v678_v53  ;;  %v2613_v53 = vor.u32 %v2726_v24, %v2612_v22 }
  0x77   : > { %v1207_v56 = vor.u32 %v1206_v41, %v1203_v38  ;;  %v1245_v48 = vrot.slane %v1243_v32, 4  ;;  %v2576_v38 = vld [vmem:[%s2960_s24 + $0xc4] sm:$0x1]  ;;  %v2578_v41 = vld [vmem:[%s2960_s24 + $0xcc] sm:$0x1] }
  0x78   : > { %v1217_v42 = vrot.slane %v1215_v35, 4  ;;  %v1246_v35 = vshll.u32 %v2577_v17, 16  ;;  %v1238_v51 = vshll.u32 %v2576_v38, 16 }
  0x7a   : > { %2644 = vmatmul.msk.bf16.vlgmr.msrb.gmra.mxu1 %vm687_vm1, %v1266_v4  ;;  %v1221_v0 = vor.u32 %v1220_v50, %v1217_v42  ;;  %v1208_v4 = vrot.slane %v1207_v56, 4  ;;  %v1248_v52 = vrot.slane %v1246_v35, 5  ;;  %v1240_v57 = vrot.slane %v1238_v51, 5 }
  0x7b   : > { %v1452_v35 = vshll.u32 %v625_v63, 16 }
  0x7c   : > { %v1222_v6 = vrot.slane %v1221_v0, 4  ;;  %v1213_v25 = vsel %vm3012_vm4, %v1208_v4, %v1212_v5  ;;  %v1249_v54 = vor.u32 %v1248_v52, %v1245_v48  ;;  %v1328_v4 = vpack.c.b16 %v681_v61, %v680_v40  ;;  %v2637_v5 = vld [vmem:[%s2960_s24 + $0x108] sm:$0xf]  ;;  %v624_v40 = vld [vmem:[%s2960_s24 + $0x40] sm:$0xf] }
  0x7d   : > { %v1262_v18 = vunpack.c.l.b16 %v1213_v25  ;;  %v1325_v61 = vunpack.c.l.b16 %v624_v40  ;;  %v1460_v25 = vpack.c.b16 %v3083_v33, %v3034_v47  ;;  %v1443_v43 = vshrl.u32 %v624_v40, 16  ;;  %v3253_v47 = vld [vmem:[%s3805_s2] ss:$0 sm:$0xff] }
  0x7e   : > { %v1227_v27 = vsel %vm3012_vm4, %v1222_v6, %v1226_v11  ;;  %v1250_v0 = vrot.slane %v1249_v54, 4  ;;  %v2731_v6 = vld [vmem:[%s2960_s24 + $0x10c] sm:$0xf0]  ;;  %v2616_v11 = vld [vmem:[%s2960_s24 + $0xc0] sm:$0xf]  ;;  %v1446_v44 = vshll.u32 %v624_v40, 16  ;;  %v1389_v52 = vpack.c.b16 %v1385_v12, %v758_v31 }
  0x7f   : > { %v1263_v34 = vunpack.c.l.b16 %v1227_v27  ;;  %v1329_v24 = vpack.c.b16 %v1325_v61, %v682_v62 }
  0x80   : > { %v1448_v28 = vrot.slane %v1446_v44, 5 }
  0x81   : > { %v1268_v42 = vpack.c.b16 %v1263_v34, %v1262_v18  ;;  %v1454_v34 = vrot.slane %v1452_v35, 5 }
  0x82   : > { %2649 = vmatmul.msk.bf16.vlgmr.msrb.gmra.mxu2 %vm687_vm1, %v1326_v20  ;;  %v2633_v20 = vld [vmem:[%s2960_s24 + $0xf8] sm:$0xf] }
  0x83   : > { %v3200_v49 = vor.u32 %v2730_v21, %v2633_v20  ;;  %v3221_v20 = vor.u32 %v2731_v6, %v2637_v5  ;;  %v2617_v21 = vor.u32 %v2727_v16, %v2616_v11  ;;  %v1712_v16 = vld [vmem:[%s3806_s3] sm:$0xf] }
  0x85   : > { %2640 = vmatmul.msk.bf16.gmra.mxu0 %vm687_vm1, %v3177_v45 }
  0x86   : > { %2619 = vmatmul.msk.bf16.gmra.mxu3 %vm687_vm1, %v2609_v46  ;;  %v1234_v46 = vrot.slane %v1232_v29, 5  ;;  %v1388_v29 = vpack.c.b16 %v757_v30, %v756_v10 }
  0x88   : > { %v1235_v50 = vor.u32 %v1234_v46, %v1231_v37 }
  0x8a   : > { %2645 = vmatmul.msk.bf16.gmra.mxu1 %vm687_vm1, %v1267_v55  ;;  %v1252_v55 = vshll.u32 %v2578_v41, 16  ;;  %v1236_v56 = vrot.slane %v1235_v50, 4 }
  0x8c   : > { %v1254_v3 = vrot.slane %v1252_v55, 5  ;;  %v1241_v17 = vsel %vm3012_vm4, %v1236_v56, %v1240_v57 }
  0x8d   : > { %v1264_v22 = vunpack.c.l.b16 %v1241_v17  ;;  %v1748_v17 = vsel %vm1746_vm5, %v1712_v16, 0  ;;  %v2685_v16 = vld [vmem:[%s3806_s3 + $0xc] sm:$0xf] }
  0x8e   : > { %1757 = vmatpush.bf16.msra.mxu1 %v1748_v17 }
  0x92   : > { %2650 = vmatmul.msk.bf16.gmra.mxu2 %vm687_vm1, %v1327_v19  ;;  %v1255_v19 = vsel %vm3012_vm4, %v1250_v0, %v1254_v3  ;;  %v2667_v0 = vld [vmem:[%s3806_s3 + $0x4] sm:$0xf] }
  0x93   : > { %v1265_v23 = vunpack.c.l.b16 %v1255_v19 }
  0x95   : > { %2641 = vmatmul.msk.bf16.gmra.mxu0 %vm687_vm1, %v3200_v49  ;;  %v1269_v8 = vpack.c.b16 %v1265_v23, %v1264_v22 }
  0x96   : > { %2620 = vmatmul.msk.bf16.gmra.mxu3 %vm687_vm1, %v2613_v53 }
  0x9a   : > { %2646 = vmatmul.msk.bf16.gmra.mxu1 %vm687_vm1, %v1268_v42 }
  0xa2   : > { %2651 = vmatmul.msk.bf16.gmra.mxu2 %vm687_vm1, %v1328_v4  ;;  %v1926_v4 = vsel %vm1746_vm5, %v2667_v0, 0 }
  0xa3   : > { %1935 = vmatpush.bf16.msra.mxu2 %v1926_v4 }
  0xa5   : > { %2642 = vmatmul.msk.bf16.gmra.mxu0 %vm687_vm1, %v3221_v20 }
  0xa6   : > { %2621 = vmatmul.msk.bf16.gmra.mxu3 %vm687_vm1, %v2617_v21 }
  0xaa   : > { %2647 = vmatmul.msk.bf16.gmra.mxu1 %vm687_vm1, %v1269_v8 }
  0xb2   : > { %2652 = vmatmul.msk.bf16.gmra.mxu2 %vm687_vm1, %v1329_v24 }
  0xb5   : > { %2659 = vmatmul.msk.bf16.vlgmr.msra.gmra.mxu0 %vm687_vm1, %v1459_v58 }
  0xb6   : > { %2654 = vmatmul.msk.bf16.vlgmr.msra.gmra.mxu3 %vm687_vm1, %v3001_v15  ;;  %v1445_v15 = vrot.slane %v1443_v43, 4 }
  0xb8   : > { %v1449_v32 = vor.u32 %v1448_v28, %v1445_v15  ;;  %v2790_v15 = vmov 0  }
  0xb9   : > { %1535 = vst.msk [vmem:[#allocation2 + $0x8] sm:$0xf] %vm1531_vm6, %v2790_v15 }
  0xba   : > { %v1450_v18 = vrot.slane %v1449_v32, 4  ;;  %1536 = vst.msk [vmem:[#allocation2 + $0xc] sm:$0x1] %vm1533_vm7, %v2790_v15 }
  0xbb   : > { %1532 = vst.msk [vmem:[#allocation2] sm:$0xf] %vm1531_vm6, %v2790_v15 }
  0xbc   : > { %v1455_v39 = vsel %vm3012_vm4, %v1450_v18, %v1454_v34  ;;  %1534 = vst.msk [vmem:[#allocation2 + $0x4] sm:$0x1] %vm1533_vm7, %v2790_v15 }
  0xbd   : > { %v1458_v1 = vunpack.c.l.b16 %v1455_v39  ;;  %1537 = vst.msk [vmem:[#allocation2 + $0x10] sm:$0xf] %vm1531_vm6, %v2790_v15 }
  0xbe   : > { %1538 = vst.msk [vmem:[#allocation2 + $0x14] sm:$0x1] %vm1533_vm7, %v2790_v15 }
  0xbf   : > { %v1462_v30 = vpack.c.b16 %v1458_v1, %v3139_v2  ;;  %1539 = vst.msk [vmem:[#allocation2 + $0x18] sm:$0xf] %vm1531_vm6, %v2790_v15 }
  0xc0   : > { %1540 = vst.msk [vmem:[#allocation2 + $0x1c] sm:$0x1] %vm1533_vm7, %v2790_v15 }
  0xc1   : > { %1541 = vst.msk [vmem:[#allocation2 + $0x20] sm:$0xf] %vm1531_vm6, %v2790_v15 }
  0xc2   : > { %v713_v27 = vpop.f32.mrf.mxu0  ;;  %1542 = vst.msk [vmem:[#allocation2 + $0x24] sm:$0x1] %vm1533_vm7, %v2790_v15 }
  0xc3   : > { %v733_v13 = vadd.f32 %v3253_v47, %v713_v27  ;;  %1543 = vst.msk [vmem:[#allocation2 + $0x28] sm:$0xf] %vm1531_vm6, %v2790_v15 }
  0xc4   : > { %1544 = vst.msk [vmem:[#allocation2 + $0x2c] sm:$0x1] %vm1533_vm7, %v2790_v15 }
  0xc5   : > { %2660 = vmatmul.msk.bf16.gmra.mxu0 %vm687_vm1, %v1460_v25  ;;  %1545 = vst.msk [vmem:[#allocation2 + $0x30] sm:$0xf] %vm1531_vm6, %v2790_v15 }
  0xc6   : > { %2655 = vmatmul.msk.bf16.gmra.mxu3 %vm687_vm1, %v1387_v14  ;;  %1546 = vst.msk [vmem:[#allocation2 + $0x34] sm:$0x1] %vm1533_vm7, %v2790_v15 }
  0xc7   : > { %v3280_v41 = vpop.f32.mrf.mxu1  ;;  %1547 = vst.msk [vmem:[#allocation2 + $0x38] sm:$0xf] %vm1531_vm6, %v2790_v15 }
  0xc8   : > { %1548 = vst.msk [vmem:[#allocation2 + $0x3c] sm:$0x1] %vm1533_vm7, %v2790_v15 }
  0xc9   : > { %v3246_v62 = vpop.f32.mrf.mxu3  ;;  %1549 = vst.msk [vmem:[#allocation2 + $0x40] sm:$0xf] %vm1531_vm6, %v2790_v15 }
  0xca   : > { %v3248_v58 = vpop.f32.mrf.mxu0  ;;  %1550 = vst.msk [vmem:[#allocation2 + $0x44] sm:$0x1] %vm1533_vm7, %v2790_v15 }
  0xcb   : > { %v734_v32 = vadd.f32 %v3253_v47, %v3248_v58  ;;  %1551 = vst.msk [vmem:[#allocation2 + $0x48] sm:$0xf] %vm1531_vm6, %v2790_v15  ;;  %v735_v58 = vadd.f32 %v3253_v47, %v3246_v62 }
  0xcc   : > { %1552 = vst.msk [vmem:[#allocation2 + $0x4c] sm:$0x1] %vm1533_vm7, %v2790_v15 }
  0xcf   : > { %v3289_v54 = vpop.f32.mrf.mxu1 }
  0xd1   : > { %v3257_v59 = vpop.f32.mrf.mxu3 }
  0xd2   : > { %v787_v33 = vpop.f32.mrf.mxu0  ;;  %v736_v62 = vadd.f32 %v3253_v47, %v3257_v59 }
  0xd3   : > { %v807_v53 = vadd.f32 %v787_v33, %v733_v13 }
  0xd4   : > { %v810_v59 = vadd.f32 %v3289_v54, %v736_v62  ;;  %v1693_v62 = vld [vmem:[#allocation2 + $0x4] sm:$0x1] }
  0xd5   : > { %2661 = vmatmul.msk.bf16.gmra.mxu0 %vm687_vm1, %v1461_v9  ;;  %v3287_v51 = vpop.f32.mrf.mxu2 }
  0xd6   : > { %2656 = vmatmul.msk.bf16.gmra.mxu3 %vm687_vm1, %v1388_v29 }
  0xd7   : > { %v3295_v56 = vpop.f32.mrf.mxu1 }
  0xd9   : > { %v3267_v37 = vpop.f32.mrf.mxu3 }
  0xda   : > { %v3269_v46 = vpop.f32.mrf.mxu0 }
  0xdb   : > { %v808_v18 = vadd.f32 %v3269_v46, %v734_v32  ;;  %v2680_v46 = vld [vmem:[%s3806_s3 + $0x8] sm:$0xf] }
  0xdd   : > { %v3293_v7 = vpop.f32.mrf.mxu2 }
  0xdf   : > { %v3307_v11 = vpop.f32.mrf.mxu1 }
  0xe1   : > { %v3274_v10 = vpop.f32.mrf.mxu3 }
  0xe2   : > { %v968_v48 = vpop.f32.mrf.mxu0 }
  0xe3   : > { %v988_v38 = vadd.f32 %v968_v48, %v807_v53  ;;  %v2035_v48 = vsel %vm1746_vm5, %v2680_v46, 0 }
  0xe4   : > { %2044 = vmatpush.bf16.msrb.mxu3 %v2035_v48 }
  0xe5   : > { %2662 = vmatmul.msk.bf16.gmra.mxu0 %vm687_vm1, %v1462_v30  ;;  %v3302_v3 = vpop.f32.mrf.mxu2 }
  0xe6   : > { %2657 = vmatmul.msk.bf16.gmra.mxu3 %vm687_vm1, %v1389_v52 }
  0xe7   : > { %v3319_v23 = vpop.f32.mrf.mxu1 }
  0xe9   : > { %v3283_v42 = vpop.f32.mrf.mxu3 }
  0xea   : > { %v3285_v50 = vpop.f32.mrf.mxu0  ;;  %v739_v46 = vadd.f32 %v3253_v47, %v3283_v42 }
  0xeb   : > { %v989_v60 = vadd.f32 %v3285_v50, %v808_v18 }
  0xed   : > { %v3313_v19 = vpop.f32.mrf.mxu2 }
  0xef   : > { %v3327_v24 = vpop.f32.mrf.mxu1 }
  0xf1   : > { %v3291_v2 = vpop.f32.mrf.mxu3 }
  0xf2   : > { %v1116_v55 = vpop.f32.mrf.mxu0  ;;  %v740_v48 = vadd.f32 %v3253_v47, %v3291_v2 }
  0xf5   : > { %v3325_v61 = vpop.f32.mrf.mxu2 }
  0xf7   : > { %v1294_v43 = vpop.f32.mrf.mxu1 }
  0xf9   : > { %v1042_v31 = vpop.f32.mrf.mxu3 }
  0xfa   : > { %v3297_v57 = vpop.f32.mrf.mxu0  ;;  %v1062_v29 = vadd.f32 %v1042_v31, %v988_v38  ;;  %v809_v38 = vadd.f32 %v3280_v41, %v735_v58 }
  0xfc   : > { %v1136_v34 = vadd.f32 %v1116_v55, %v1062_v29  ;;  %v990_v4 = vadd.f32 %v3287_v51, %v809_v38  ;;  %v738_v51 = vadd.f32 %v3253_v47, %v3274_v10  ;;  %v1637_v38 = vld [vmem:[#allocation2 + $0x8] sm:$0xf] }
  0xfd   : > { %v3333_v14 = vpop.f32.mrf.mxu2 }
  0xfe   : > { %v1314_v12 = vadd.f32 %v1294_v43, %v1136_v34  ;;  %v2095_v43 = vsel %vm1746_vm5, %v2685_v16, 0  ;;  %v991_v34 = vadd.f32 %v3293_v7, %v810_v59  ;;  %v812_v54 = vadd.f32 %v3307_v11, %v738_v51 }
  0xff   : > { %v1296_v9 = vpop.f32.mrf.mxu1  ;;  %2104 = vmatpush.bf16.msrb.mxu0 %v2095_v43 }
 0x101   : > { %v1044_v5 = vpop.f32.mrf.mxu3 }
 0x102   : > { %v3305_v6 = vpop.f32.mrf.mxu0  ;;  %v1063_v30 = vadd.f32 %v1044_v5, %v989_v60 }
 0x104   : > { %v1137_v50 = vadd.f32 %v3297_v57, %v1063_v30  ;;  %v737_v57 = vadd.f32 %v3253_v47, %v3267_v37 }
 0x105   : > { %v1354_v63 = vpop.f32.mrf.mxu2 }
 0x106   : > { %v1374_v52 = vadd.f32 %v1354_v63, %v1314_v12  ;;  %v1315_v15 = vadd.f32 %v1296_v9, %v1137_v50  ;;  %v811_v60 = vadd.f32 %v3295_v56, %v737_v57  ;;  %v3393_v12 = vld [vmem:[#allocation2] sm:$0xf] }
 0x107   : > { %v1299_v1 = vpop.f32.mrf.mxu1  ;;  %v1791_v42 = vshll.u32 %v3393_v12, 16 }
 0x109   : > { %v3315_v21 = vpop.f32.mrf.mxu3 }
 0x10a   : > { %v3317_v22 = vpop.f32.mrf.mxu0  ;;  %v1064_v41 = vadd.f32 %v3315_v21, %v990_v4 }
 0x10d   : > { %v1356_v35 = vpop.f32.mrf.mxu2 }
 0x10e   : > { %v1375_v32 = vadd.f32 %v1356_v35, %v1315_v15  ;;  %v992_v35 = vadd.f32 %v3302_v3, %v811_v60  ;;  %v2672_v15 = vrot.slane %v3393_v12, 9 }
 0x10f   : > { %v1301_v63 = vpop.f32.mrf.mxu1 }
 0x111   : > { %v3321_v40 = vpop.f32.mrf.mxu3 }
 0x112   : > { %v3323_v8 = vpop.f32.mrf.mxu0  ;;  %v1065_v10 = vadd.f32 %v3321_v40, %v991_v34  ;;  %v1643_v40 = vld [vmem:[#allocation2 + $0xc] sm:$0x1] }
 0x114   : > { %v1139_v47 = vadd.f32 %v3317_v22, %v1065_v10  ;;  %v1978_v22 = vrot.slane %v1693_v62, 5 }
 0x115   : > { %v1359_v5 = vpop.f32.mrf.mxu2 }
 0x116   : > { %v1317_v34 = vadd.f32 %v1301_v63, %v1139_v47 }
 0x117   : > { %v1304_v4 = vpop.f32.mrf.mxu1 }
 0x119   : > { %v3329_v25 = vpop.f32.mrf.mxu3 }
 0x11a   : > { %v3331_v27 = vpop.f32.mrf.mxu0  ;;  %v1066_v2 = vadd.f32 %v3329_v25, %v992_v35  ;;  %v993_v25 = vadd.f32 %v3313_v19, %v812_v54  ;;  %v1797_v54 = vshll.u32 %v1693_v62, 16 }
 0x11d   : > { %v1361_v11 = vpop.f32.mrf.mxu2 }
 0x121   : > { %v3335_v44 = vpop.f32.mrf.mxu3 }
 0x122   : > { %v3338_v28 = vpop.f32.mrf.mxu0 }
 0x129   : > { %v3347_v13 = vpop.f32.mrf.mxu3 }
 0x12a   : > { %v3350_v33 = vpop.f32.mrf.mxu0 }
 0x131   : > { %v3361_v53 = vpop.f32.mrf.mxu3 }
 0x132   : > { %v1487_v39 = vpop.f32.mrf.mxu0 }
 0x139   : > { %v1414_v55 = vpop.f32.mrf.mxu3 }
 0x13a   : > { %v1434_v31 = vadd.f32 %v1414_v55, %v1374_v52  ;;  %v1489_v0 = vpop.f32.mrf.mxu0  ;;  %v1788_v55 = vshrl.u32 %v3393_v12, 16 }
 0x13c   : > { %v1507_v17 = vadd.f32 %v1487_v39, %v1434_v31  ;;  %v1138_v39 = vadd.f32 %v3305_v6, %v1064_v41  ;;  %v813_v41 = vadd.f32 %v3319_v23, %v739_v46  ;;  %v2696_v23 = vld [vmem:[%s3806_s3 + $0x14] sm:$0xf] }
 0x13e   : > { %v1515_v29 = vmax.f32 %v1507_v17, 0.0  ;;  %v1316_v52 = vadd.f32 %v1299_v1, %v1138_v39  ;;  %v1140_v39 = vadd.f32 %v3323_v8, %v1066_v2  ;;  %v994_v10 = vadd.f32 %v3325_v61, %v813_v41  ;;  %v1306_v2 = vpop.f32.mrf.mxu1 }
 0x140   : > { %v1523_v18 = vpack.c.bf16 %v1515_v29, %v1515_v29  ;;  %v1376_v1 = vadd.f32 %v1359_v5, %v1316_v52  ;;  %v1790_v29 = vrot.slane %v1788_v55, 4  ;;  %v1318_v52 = vadd.f32 %v1304_v4, %v1140_v39 }
 0x141   : > { %v1416_v21 = vpop.f32.mrf.mxu3 }
 0x142   : > { %v1554_v58 = vshrl.u32 %v1523_v18, 16  ;;  %v1435_v37 = vadd.f32 %v1416_v21, %v1375_v32  ;;  %v1492_v9 = vpop.f32.mrf.mxu0  ;;  %v1557_v7 = vshll.u32 %v1523_v18, 16  ;;  %v1793_v32 = vrot.slane %v1791_v42, 5 }
 0x143   : > { %v814_v18 = vadd.f32 %v3327_v24, %v740_v48  ;;  %v2232_v21 = vsel %vm1746_vm5, %v2696_v23, 0  ;;  %v1979_v24 = vsel %vm3426_vm14, %v2672_v15, %v1978_v22  ;;  %v1655_v23 = vld [vmem:[#allocation2 + $0x1c] sm:$0x1] }
 0x144   : > { %v1556_v30 = vrot.slane %v1554_v58, 7  ;;  %v1508_v56 = vadd.f32 %v1489_v0, %v1435_v37  ;;  %2241 = vmatpush.bf16.msrb.mxu2 %v2232_v21  ;;  %v1794_v48 = vor.u32 %v1793_v32, %v1790_v29  ;;  %v2010_v47 = vunpack.c.l.b16 %v1979_v24  ;;  %v1652_v32 = vld [vmem:[#allocation2 + $0x18] sm:$0xf] }
 0x145   : > { %v3438_v35 = vadd.f32 %v3333_v14, %v814_v18 }
 0x146   : > { %v1559_v50 = vor.u32 %v1557_v7, %v1556_v30  ;;  %v1560_v31 = vrot.slane %v1556_v30, 4  ;;  %v1516_v0 = vmax.f32 %v1508_v56, 0.0  ;;  %v1377_v30 = vadd.f32 %v1361_v11, %v1317_v34  ;;  %v1646_v7 = vld [vmem:[#allocation2 + $0x10] sm:$0xf]  ;;  %v1649_v56 = vld [vmem:[#allocation2 + $0x14] sm:$0x1] }
 0x148   : > { %v1638_v16 = vsel %vm3399_vm10, %v1559_v50, %v1637_v38  ;;  %v1644_v17 = vsel %vm3409_vm11, %v1560_v31, %v1643_v40  ;;  %v1524_v43 = vpack.c.bf16 %v1516_v0, %v1516_v0  ;;  %v1364_v38 = vpop.f32.mrf.mxu2  ;;  %v1721_v40 = vunpack.c.l.b16 %v3393_v12 }
 0x149   : > { %1639 = vst [vmem:[#allocation2 + $0x8] sm:$0xf] %v1638_v16  ;;  %v1419_v57 = vpop.f32.mrf.mxu3  ;;  %v1799_v50 = vrot.slane %v1797_v54, 5  ;;  %v1795_v16 = vrot.slane %v1794_v48, 4  ;;  %v1378_v54 = vadd.f32 %v1364_v38, %v1318_v52 }
 0x14a   : > { %1645 = vst [vmem:[#allocation2 + $0xc] sm:$0x1] %v1644_v17  ;;  %v1562_v5 = vshrl.u32 %v1524_v43, 16  ;;  %v1436_v59 = vadd.f32 %v1419_v57, %v1376_v1  ;;  %v1494_v19 = vpop.f32.mrf.mxu0  ;;  %v1565_v58 = vshll.u32 %v1524_v43, 16 }
 0x14c   : > { %v1564_v60 = vrot.slane %v1562_v5, 7  ;;  %v1509_v37 = vadd.f32 %v1492_v9, %v1436_v59  ;;  %v1067_v9 = vadd.f32 %v3335_v44, %v993_v25  ;;  %v2690_v5 = vld [vmem:[%s3806_s3 + $0x10] sm:$0xf]  ;;  %v1068_v59 = vadd.f32 %v3347_v13, %v994_v10 }
 0x14d   : > { %v1800_v10 = vsel %vm3012_vm4, %v1795_v16, %v1799_v50  ;;  %v1658_v16 = vld [vmem:[#allocation2 + $0x20] sm:$0xf] }
 0x14e   : > { %v1567_v8 = vor.u32 %v1565_v58, %v1564_v60  ;;  %v1568_v63 = vrot.slane %v1564_v60, 4  ;;  %v1517_v46 = vmax.f32 %v1509_v37, 0.0  ;;  %v1141_v21 = vadd.f32 %v3331_v27, %v1067_v9 }
 0x150   : > { %v1647_v61 = vsel %vm3399_vm10, %v1567_v8, %v1646_v7  ;;  %v1650_v14 = vsel %vm3409_vm11, %v1568_v63, %v1649_v56  ;;  %v1525_v11 = vpack.c.bf16 %v1517_v46, %v1517_v46  ;;  %v1694_v55 = vld [vmem:[#allocation2 + $0x8] sm:$0xf]  ;;  %v1366_v63 = vpop.f32.mrf.mxu2  ;;  %v1142_v46 = vadd.f32 %v3338_v28, %v1068_v59  ;;  %v1309_v28 = vpop.f32.mrf.mxu1 }
 0x151   : > { %1648 = vst [vmem:[#allocation2 + $0x10] sm:$0xf] %v1647_v61  ;;  %v1421_v31 = vpop.f32.mrf.mxu3  ;;  %v1722_v0 = vunpack.c.l.b16 %v1694_v55  ;;  %v1695_v62 = vld [vmem:[#allocation2 + $0xc] sm:$0x1]  ;;  %v2673_v42 = vrot.slane %v1694_v55, 9  ;;  %v1802_v44 = vshrl.u32 %v1694_v55, 16 }
 0x152   : > { %1651 = vst [vmem:[#allocation2 + $0x14] sm:$0x1] %v1650_v14  ;;  %v1570_v12 = vshrl.u32 %v1525_v11, 16  ;;  %v1437_v1 = vadd.f32 %v1421_v31, %v1377_v30  ;;  %v1982_v4 = vrot.slane %v1695_v62, 5  ;;  %v1573_v17 = vshll.u32 %v1525_v11, 16  ;;  %v1497_v18 = vpop.f32.mrf.mxu0 }
 0x153   : > { %v1729_v43 = vpack.c.b16 %v1722_v0, %v1721_v40  ;;  %v1804_v41 = vrot.slane %v1802_v44, 4  ;;  %v1805_v57 = vshll.u32 %v1694_v55, 16  ;;  %v1811_v25 = vshll.u32 %v1695_v62, 16 }
 0x154   : > { %v1572_v15 = vrot.slane %v1570_v12, 7  ;;  %v1510_v22 = vadd.f32 %v1494_v19, %v1437_v1  ;;  %v3450_v29 = vsel %vm3426_vm14, %v2673_v42, %v1982_v4  ;;  %v2168_v19 = vsel %vm1746_vm5, %v2690_v5, 0 }
 0x155   : > { %2663 = vmatmul.msk.bf16.vlgmr.msra.gmra.mxu1 %vm1733_vm15, %v1729_v43  ;;  %v2011_v34 = vunpack.c.l.b16 %v3450_v29  ;;  %v1807_v39 = vrot.slane %v1805_v57, 5  ;;  %v1813_v8 = vrot.slane %v1811_v25, 5  ;;  %v1901_v11 = vunpack.c.l.b16 %v1800_v10 }
 0x156   : > { %v1575_v60 = vor.u32 %v1573_v17, %v1572_v15  ;;  %v1576_v58 = vrot.slane %v1572_v15, 4  ;;  %v1518_v37 = vmax.f32 %v1510_v22, 0.0  ;;  %2177 = vmatpush.bf16.msrb.mxu1 %v2168_v19  ;;  %v1319_v4 = vadd.f32 %v1306_v2, %v1141_v21  ;;  %v1661_v17 = vld [vmem:[#allocation2 + $0x24] sm:$0x1] }
 0x157   : > { %v2018_v13 = vpack.c.b16 %v2011_v34, %v2010_v47  ;;  %v1808_v30 = vor.u32 %v1807_v39, %v1804_v41  ;;  %v1320_v59 = vadd.f32 %v1309_v28, %v1142_v46  ;;  %v1069_v2 = vadd.f32 %v3361_v53, %v3438_v35 }
 0x158   : > { %v1653_v7 = vsel %vm3399_vm10, %v1575_v60, %v1652_v32  ;;  %v1656_v56 = vsel %vm3409_vm11, %v1576_v58, %v1655_v23  ;;  %v1526_v24 = vpack.c.bf16 %v1518_v37, %v1518_v37  ;;  %v1696_v27 = vld [vmem:[#allocation2 + $0x10] sm:$0xf]  ;;  %v1379_v5 = vadd.f32 %v1366_v63, %v1319_v4 }
 0x159   : > { %1654 = vst [vmem:[#allocation2 + $0x18] sm:$0xf] %v1653_v7  ;;  %2681 = vmatmul.msk.bf16.vlgmr.msrb.gmra.mxu3 %vm1733_vm15, %v2018_v13  ;;  %v1424_v48 = vpop.f32.mrf.mxu3  ;;  %v1723_v52 = vunpack.c.l.b16 %v1696_v27  ;;  %v1809_v9 = vrot.slane %v1808_v30, 4  ;;  %v1697_v38 = vld [vmem:[#allocation2 + $0x14] sm:$0x1]  ;;  %v2674_v40 = vrot.slane %v1696_v27, 9 }
 0x15a   : > { %1657 = vst [vmem:[#allocation2 + $0x1c] sm:$0x1] %v1656_v56  ;;  %v1578_v61 = vshrl.u32 %v1526_v24, 16  ;;  %v1438_v14 = vadd.f32 %v1424_v48, %v1378_v54  ;;  %v1986_v55 = vrot.slane %v1697_v38, 5  ;;  %v1816_v62 = vshrl.u32 %v1696_v27, 16  ;;  %v1499_v32 = vpop.f32.mrf.mxu0  ;;  %v1369_v56 = vpop.f32.mrf.mxu2 }
 0x15b   : > { %v2078_v50 = vpack.c.b16 %v1723_v52, %v1722_v0  ;;  %v1814_v31 = vsel %vm3012_vm4, %v1809_v9, %v1813_v8  ;;  %v1819_v42 = vshll.u32 %v1696_v27, 16  ;;  %v1581_v44 = vshll.u32 %v1526_v24, 16  ;;  %v1664_v48 = vld [vmem:[#allocation2 + $0x28] sm:$0xf] }
 0x15c   : > { %v1580_v47 = vrot.slane %v1578_v61, 7  ;;  %v1511_v12 = vadd.f32 %v1497_v18, %v1438_v14  ;;  %v3472_v1 = vunpack.c.l.b16 %v1814_v31  ;;  %v3477_v43 = vsel %vm3426_vm14, %v2674_v40, %v1986_v55 }
 0x15d   : > { %2686 = vmatmul.msk.bf16.vlgmr.msrb.gmra.mxu0 %vm1733_vm15, %v2078_v50  ;;  %v1818_v0 = vrot.slane %v1816_v62, 4  ;;  %v1821_v41 = vrot.slane %v1819_v42, 5  ;;  %v2012_v13 = vunpack.c.l.b16 %v3477_v43  ;;  %v1825_v10 = vshll.u32 %v1697_v38, 16  ;;  %v1667_v38 = vld [vmem:[#allocation2 + $0x2c] sm:$0x1] }
 0x15e   : > { %v1583_v57 = vor.u32 %v1581_v44, %v1580_v47  ;;  %v1584_v15 = vrot.slane %v1580_v47, 4  ;;  %v1519_v22 = vmax.f32 %v1511_v12, 0.0  ;;  %v1909_v25 = vpack.c.b16 %v3472_v1, %v1901_v11 }
 0x15f   : > { %v1822_v23 = vor.u32 %v1821_v41, %v1818_v0  ;;  %v1827_v11 = vrot.slane %v1825_v10, 5  ;;  %v1380_v42 = vadd.f32 %v1369_v56, %v1320_v59  ;;  %v1143_v41 = vadd.f32 %v3350_v33, %v1069_v2  ;;  %v1673_v56 = vld [vmem:[#allocation2 + $0x34] sm:$0x1] }
 0x160   : > { %v1659_v18 = vsel %vm3399_vm10, %v1583_v57, %v1658_v16  ;;  %v1662_v39 = vsel %vm3409_vm11, %v1584_v15, %v1661_v17  ;;  %v1527_v19 = vpack.c.bf16 %v1519_v22, %v1519_v22  ;;  %2668 = vmatmul.msk.bf16.vlgmr.msra.gmra.mxu2 %vm1733_vm15, %v1909_v25  ;;  %v1698_v21 = vld [vmem:[#allocation2 + $0x18] sm:$0xf] }
 0x161   : > { %1660 = vst [vmem:[#allocation2 + $0x20] sm:$0xf] %v1659_v18  ;;  %v1426_v60 = vpop.f32.mrf.mxu3  ;;  %v1724_v58 = vunpack.c.l.b16 %v1698_v21  ;;  %v2675_v37 = vrot.slane %v1698_v21, 9  ;;  %v1699_v54 = vld [vmem:[#allocation2 + $0x1c] sm:$0x1]  ;;  %v1823_v7 = vrot.slane %v1822_v23, 4 }
 0x162   : > { %1663 = vst [vmem:[#allocation2 + $0x24] sm:$0x1] %v1662_v39  ;;  %v1586_v53 = vshrl.u32 %v1527_v19, 16  ;;  %v1439_v35 = vadd.f32 %v1426_v60, %v1379_v5  ;;  %v1990_v30 = vrot.slane %v1699_v54, 5  ;;  %v1589_v24 = vshll.u32 %v1527_v19, 16  ;;  %v1502_v57 = vpop.f32.mrf.mxu0 }
 0x163   : > { %v3488_v27 = vpack.c.b16 %v1724_v58, %v1723_v52  ;;  %v1830_v8 = vshrl.u32 %v1698_v21, 16  ;;  %v1833_v63 = vshll.u32 %v1698_v21, 16  ;;  %v1839_v61 = vshll.u32 %v1699_v54, 16 }
 0x164   : > { %v1588_v46 = vrot.slane %v1586_v53, 7  ;;  %v1512_v9 = vadd.f32 %v1499_v32, %v1439_v35  ;;  %v3492_v40 = vsel %vm3426_vm14, %v2675_v37, %v1990_v30  ;;  %v1828_v47 = vsel %vm3012_vm4, %v1823_v7, %v1827_v11  ;;  %v1311_v32 = vpop.f32.mrf.mxu1  ;;  %v1371_v30 = vpop.f32.mrf.mxu2  ;;  %v1670_v7 = vld [vmem:[#allocation2 + $0x30] sm:$0xf] }
 0x165   : > { %2664 = vmatmul.msk.bf16.gmra.mxu1 %vm1733_vm15, %v3488_v27  ;;  %v2013_v14 = vunpack.c.l.b16 %v3492_v40  ;;  %v1832_v55 = vrot.slane %v1830_v8, 4  ;;  %v1835_v52 = vrot.slane %v1833_v63, 5  ;;  %v1841_v0 = vrot.slane %v1839_v61, 5 }
 0x166   : > { %v1591_v50 = vor.u32 %v1589_v24, %v1588_v46  ;;  %v1592_v31 = vrot.slane %v1588_v46, 4  ;;  %v1520_v62 = vmax.f32 %v1512_v9, 0.0  ;;  %v3514_v39 = vunpack.c.l.b16 %v1828_v47 }
 0x167   : > { %v3501_v28 = vpack.c.b16 %v2013_v14, %v2012_v13  ;;  %v1836_v44 = vor.u32 %v1835_v52, %v1832_v55  ;;  %v1321_v35 = vadd.f32 %v1311_v32, %v1143_v41 }
 0x168   : > { %v1665_v12 = vsel %vm3399_vm10, %v1591_v50, %v1664_v48  ;;  %v1668_v4 = vsel %vm3409_vm11, %v1592_v31, %v1667_v38  ;;  %v1528_v16 = vpack.c.bf16 %v1520_v62, %v1520_v62  ;;  %v1700_v17 = vld [vmem:[#allocation2 + $0x20] sm:$0xf] }
 0x169   : > { %1666 = vst [vmem:[#allocation2 + $0x28] sm:$0xf] %v1665_v12  ;;  %2682 = vmatmul.msk.bf16.gmra.mxu3 %vm1733_vm15, %v3501_v28  ;;  %v1429_v15 = vpop.f32.mrf.mxu3  ;;  %v1725_v22 = vunpack.c.l.b16 %v1700_v17  ;;  %v1837_v25 = vrot.slane %v1836_v44, 4  ;;  %v3512_v5 = vld [vmem:[#allocation2 + $0x24] sm:$0x1]  ;;  %v2676_v59 = vrot.slane %v1700_v17, 9  ;;  %v1381_v38 = vadd.f32 %v1371_v30, %v1321_v35 }
 0x16a   : > { %1669 = vst [vmem:[#allocation2 + $0x2c] sm:$0x1] %v1668_v4  ;;  %v1594_v23 = vshrl.u32 %v1528_v16, 16  ;;  %v1440_v18 = vadd.f32 %v1429_v15, %v1380_v42  ;;  %v1994_v19 = vrot.slane %v3512_v5, 5  ;;  %v1844_v21 = vshrl.u32 %v1700_v17, 16 }
 0x16b   : > { %v2079_v33 = vpack.c.b16 %v1725_v22, %v1724_v58  ;;  %v1842_v2 = vsel %vm3012_vm4, %v1837_v25, %v1841_v0  ;;  %v1847_v60 = vshll.u32 %v1700_v17, 16  ;;  %v1597_v54 = vshll.u32 %v1528_v16, 16  ;;  %v1504_v0 = vpop.f32.mrf.mxu0 }
 0x16c   : > { %v1596_v37 = vrot.slane %v1594_v23, 7  ;;  %v1513_v10 = vadd.f32 %v1502_v57, %v1440_v18  ;;  %v3519_v53 = vunpack.c.l.b16 %v1842_v2  ;;  %v3524_v24 = vsel %vm3426_vm14, %v2676_v59, %v1994_v19  ;;  %v1676_v23 = vld [vmem:[#allocation2 + $0x38] sm:$0xf]  ;;  %v1679_v18 = vld [vmem:[#allocation2 + $0x3c] sm:$0x1] }
 0x16d   : > { %2687 = vmatmul.msk.bf16.gmra.mxu0 %vm1733_vm15, %v2079_v33  ;;  %v1846_v58 = vrot.slane %v1844_v21, 4  ;;  %v1849_v8 = vrot.slane %v1847_v60, 5  ;;  %v2014_v44 = vunpack.c.l.b16 %v3524_v24  ;;  %v1853_v17 = vshll.u32 %v3512_v5, 16  ;;  %v2701_v60 = vld [vmem:[%s3806_s3 + $0x18] sm:$0xf] }
 0x16e   : > { %v1599_v63 = vor.u32 %v1597_v54, %v1596_v37  ;;  %v1600_v46 = vrot.slane %v1596_v37, 4  ;;  %v1521_v48 = vmax.f32 %v1513_v10, 0.0  ;;  %v3528_v9 = vpack.c.b16 %v3519_v53, %v3514_v39 }
 0x16f   : > { %v1850_v61 = vor.u32 %v1849_v8, %v1846_v58  ;;  %v1855_v35 = vrot.slane %v1853_v17, 5  ;;  %v2216_v29 = vpack.c.b16 %v2014_v44, %v2013_v14  ;;  %v1711_v14 = vld [vmem:[#allocation2 + $0x4c] sm:$0x1] }
 0x170   : > { %v1671_v11 = vsel %vm3399_vm10, %v1599_v63, %v1670_v7  ;;  %v1674_v55 = vsel %vm3409_vm11, %v1600_v46, %v1673_v56  ;;  %v1529_v52 = vpack.c.bf16 %v1521_v48, %v1521_v48  ;;  %2669 = vmatmul.msk.bf16.gmra.mxu2 %vm1733_vm15, %v3528_v9  ;;  %v1702_v50 = vld [vmem:[#allocation2 + $0x28] sm:$0xf]  ;;  %v2280_v56 = vsel %vm1746_vm5, %v2701_v60, 0 }
 0x171   : > { %1672 = vst [vmem:[#allocation2 + $0x30] sm:$0xf] %v1671_v11  ;;  %v1431_v31 = vpop.f32.mrf.mxu3  ;;  %v1726_v62 = vunpack.c.l.b16 %v1702_v50  ;;  %v2677_v42 = vrot.slane %v1702_v50, 9  ;;  %v1703_v47 = vld [vmem:[#allocation2 + $0x2c] sm:$0x1]  ;;  %v1851_v57 = vrot.slane %v1850_v61, 4  ;;  %2289 = vmatpush.bf16.msra.mxu3 %v2280_v56 }
 0x172   : > { %1675 = vst [vmem:[#allocation2 + $0x34] sm:$0x1] %v1674_v55  ;;  %v1602_v12 = vshrl.u32 %v1529_v52, 16  ;;  %v1441_v4 = vadd.f32 %v1431_v31, %v1381_v38  ;;  %v1998_v16 = vrot.slane %v1703_v47, 5  ;;  %v1858_v15 = vshrl.u32 %v1702_v50, 16 }
 0x173   : > { %v3538_v41 = vpack.c.b16 %v1726_v62, %v1725_v22  ;;  %v1861_v25 = vshll.u32 %v1702_v50, 16  ;;  %v1605_v32 = vshll.u32 %v1529_v52, 16  ;;  %v1867_v21 = vshll.u32 %v1703_v47, 16 }
 0x174   : > { %v1604_v59 = vrot.slane %v1602_v12, 7  ;;  %v1514_v19 = vadd.f32 %v1504_v0, %v1441_v4  ;;  %v3542_v33 = vsel %vm3426_vm14, %v2677_v42, %v1998_v16  ;;  %v1860_v2 = vrot.slane %v1858_v15, 4  ;;  %v2706_v4 = vld [vmem:[%s3806_s3 + $0x1c] sm:$0xf]  ;;  %v1682_v0 = vld [vmem:[#allocation2 + $0x40] sm:$0xf] }
 0x175   : > { %2665 = vmatmul.msk.bf16.gmra.mxu1 %vm1733_vm15, %v3538_v41  ;;  %v2015_v5 = vunpack.c.l.b16 %v3542_v33  ;;  %v1863_v22 = vrot.slane %v1861_v25, 5  ;;  %v1856_v48 = vsel %vm3012_vm4, %v1851_v57, %v1855_v35  ;;  %v1869_v11 = vrot.slane %v1867_v21, 5  ;;  %v1685_v25 = vld [vmem:[#allocation2 + $0x44] sm:$0x1] }
 0x176   : > { %v1607_v37 = vor.u32 %v1605_v32, %v1604_v59  ;;  %v1608_v54 = vrot.slane %v1604_v59, 4  ;;  %v1522_v10 = vmax.f32 %v1514_v19, 0.0  ;;  %v3567_v42 = vunpack.c.l.b16 %v1856_v48 }
 0x177   : > { %v3554_v30 = vpack.c.b16 %v2015_v5, %v2014_v44  ;;  %v1864_v7 = vor.u32 %v1863_v22, %v1860_v2  ;;  %v2341_v32 = vsel %vm1746_vm5, %v2706_v4, 0 }
 0x178   : > { %v1677_v58 = vsel %vm3399_vm10, %v1607_v37, %v1676_v23  ;;  %v1680_v8 = vsel %vm3409_vm11, %v1608_v54, %v1679_v18  ;;  %v1530_v63 = vpack.c.bf16 %v1522_v10, %v1522_v10  ;;  %v1704_v46 = vld [vmem:[#allocation2 + $0x30] sm:$0xf]  ;;  %2350 = vmatpush.bf16.msra.mxu0 %v2341_v32  ;;  %v2432_v54 = vld [vmem:[%s3808_s5] sm:$0x3] }
 0x179   : > { %1678 = vst [vmem:[#allocation2 + $0x38] sm:$0xf] %v1677_v58  ;;  %2683 = vmatmul.msk.bf16.gmra.mxu3 %vm1733_vm15, %v3554_v30  ;;  %v1727_v61 = vunpack.c.l.b16 %v1704_v46  ;;  %v1865_v38 = vrot.slane %v1864_v7, 4  ;;  %v1872_v52 = vshrl.u32 %v1704_v46, 16  ;;  %v1705_v47 = vld [vmem:[#allocation2 + $0x34] sm:$0x1] }
 0x17a   : > { %1681 = vst [vmem:[#allocation2 + $0x3c] sm:$0x1] %v1680_v8  ;;  %v1610_v55 = vshrl.u32 %v1530_v63, 16  ;;  %v1875_v12 = vshll.u32 %v1704_v46, 16  ;;  %v1613_v17 = vshll.u32 %v1530_v63, 16  ;;  %v2002_v2 = vrot.slane %v1705_v47, 5 }
 0x17b   : > { %v2080_v50 = vpack.c.b16 %v1727_v61, %v1726_v62  ;;  %v1870_v31 = vsel %vm3012_vm4, %v1865_v38, %v1869_v11  ;;  %v1874_v15 = vrot.slane %v1872_v52, 4  ;;  %v2678_v62 = vrot.slane %v1704_v46, 9  ;;  %v2712_v10 = vld [vmem:[%s3806_s3 + $0x20] sm:$0xf] }
 0x17c   : > { %v1612_v16 = vrot.slane %v1610_v55, 7  ;;  %v3572_v57 = vunpack.c.l.b16 %v1870_v31  ;;  %v1877_v59 = vrot.slane %v1875_v12, 5  ;;  %v1881_v56 = vshll.u32 %v1705_v47, 16 }
 0x17d   : > { %2688 = vmatmul.msk.bf16.gmra.mxu0 %vm1733_vm15, %v2080_v50  ;;  %v3594_v3 = vsel %vm3426_vm14, %v2678_v62, %v2002_v2  ;;  %v2438_v38 = vsel %vm700_vm0, %v2432_v54, 0  ;;  %v2393_v11 = vsel %vm1746_vm5, %v2712_v10, 0 }
 0x17e   : > { %v1615_v23 = vor.u32 %v1613_v17, %v1612_v16  ;;  %v1616_v18 = vrot.slane %v1612_v16, 4  ;;  %v3578_v19 = vpack.c.b16 %v3572_v57, %v3567_v42  ;;  %v1878_v22 = vor.u32 %v1877_v59, %v1874_v15  ;;  %2447 = vmatpush.bf16.msra.mxu2 %v2438_v38  ;;  %2402 = vmatpush.bf16.msra.mxu1 %v2393_v11 }
 0x17f   : > { %v2016_v47 = vunpack.c.l.b16 %v3594_v3  ;;  %v1883_v4 = vrot.slane %v1881_v56, 5 }
 0x180   : > { %v1683_v21 = vsel %vm3399_vm10, %v1615_v23, %v1682_v0  ;;  %v1686_v60 = vsel %vm3409_vm11, %v1616_v18, %v1685_v25  ;;  %2670 = vmatmul.msk.bf16.gmra.mxu2 %vm1733_vm15, %v3578_v19  ;;  %v1706_v37 = vld [vmem:[#allocation2 + $0x38] sm:$0xf]  ;;  %v1879_v48 = vrot.slane %v1878_v22, 4 }
 0x181   : > { %1684 = vst [vmem:[#allocation2 + $0x40] sm:$0xf] %v1683_v21  ;;  %v1728_v35 = vunpack.c.l.b16 %v1706_v37  ;;  %v2679_v7 = vrot.slane %v1706_v37, 9  ;;  %v1707_v6 = vld [vmem:[#allocation2 + $0x3c] sm:$0x1]  ;;  %v1886_v8 = vshrl.u32 %v1706_v37, 16 }
 0x182   : > { %1687 = vst [vmem:[#allocation2 + $0x44] sm:$0x1] %v1686_v60  ;;  %v2006_v58 = vrot.slane %v1707_v6, 5  ;;  %v1889_v63 = vshll.u32 %v1706_v37, 16  ;;  %v1895_v31 = vshll.u32 %v1707_v6, 16  ;;  %v1884_v0 = vsel %vm3012_vm4, %v1879_v48, %v1883_v4 }
 0x183   : > { %v1732_v46 = vpack.c.b16 %v1728_v35, %v1727_v61  ;;  %v1888_v52 = vrot.slane %v1886_v8, 4  ;;  %v1907_v22 = vunpack.c.l.b16 %v1884_v0  ;;  %v2152_v6 = vpack.c.b16 %v3567_v42, %v3519_v53 }
 0x184   : > { %v2007_v55 = vsel %vm3426_vm14, %v2679_v7, %v2006_v58  ;;  %v1891_v50 = vrot.slane %v1889_v63, 5  ;;  %v1897_v25 = vrot.slane %v1895_v31, 5  ;;  %v2151_v7 = vpack.c.b16 %v3514_v39, %v3472_v1 }
 0x185   : > { %2666 = vmatmul.msk.bf16.gmra.mxu1 %vm1733_vm15, %v1732_v46  ;;  %v2017_v12 = vunpack.c.l.b16 %v2007_v55  ;;  %v2153_v39 = vpack.c.b16 %v1907_v22, %v3572_v57  ;;  %v2329_v58 = vshll.u32 %v1711_v14, 16  ;;  %v2217_v57 = vpack.c.b16 %v2016_v47, %v2015_v5 }
 0x186   : > { %v1892_v61 = vor.u32 %v1891_v50, %v1888_v52 }
 0x187   : > { %v3602_v16 = vpack.c.b16 %v2017_v12, %v2016_v47  ;;  %v2331_v48 = vrot.slane %v2329_v58, 5 }
 0x188   : > { %v1708_v17 = vld [vmem:[#allocation2 + $0x40] sm:$0xf]  ;;  %v1893_v15 = vrot.slane %v1892_v61, 4 }
 0x189   : > { %2684 = vmatmul.msk.bf16.gmra.mxu3 %vm1733_vm15, %v3602_v16  ;;  %v2077_v62 = vunpack.c.l.b16 %v1708_v17  ;;  %v1709_v59 = vld [vmem:[#allocation2 + $0x44] sm:$0x1]  ;;  %v2695_v23 = vrot.slane %v1708_v17, 9  ;;  %v2135_v1 = vshrl.u32 %v1708_v17, 16 }
 0x18a   : > { %v1898_v32 = vsel %vm3012_vm4, %v1893_v15, %v1897_v25  ;;  %v2210_v18 = vrot.slane %v1709_v59, 5  ;;  %v2144_v42 = vshll.u32 %v1709_v59, 16 }
 0x18b   : > { %v2081_v2 = vpack.c.b16 %v2077_v62, %v1728_v35  ;;  %v1908_v21 = vunpack.c.l.b16 %v1898_v32  ;;  %v2215_v35 = vpack.c.b16 %v2012_v13, %v2011_v34  ;;  %v2137_v34 = vrot.slane %v2135_v1, 4  ;;  %v1710_v13 = vld [vmem:[#allocation2 + $0x48] sm:$0xf] }
 0x18c   : > { %v3612_v60 = vsel %vm3426_vm14, %v2695_v23, %v2210_v18  ;;  %v2146_v40 = vrot.slane %v2144_v42, 5  ;;  %v2274_v11 = vunpack.c.l.b16 %v1710_v13  ;;  %v2711_v59 = vrot.slane %v1710_v13, 9 }
 0x18d   : > { %2689 = vmatmul.msk.bf16.gmra.mxu0 %vm1733_vm15, %v2081_v2  ;;  %v1912_v37 = vpack.c.b16 %v1908_v21, %v1907_v22  ;;  %v2214_v54 = vunpack.c.l.b16 %v3612_v60  ;;  %v2383_v32 = vrot.slane %v1711_v14, 5 }
 0x18e   : > { %v2275_v55 = vpack.c.b16 %v2274_v11, %v2077_v62 }
 0x18f   : > { %v2218_v10 = vpack.c.b16 %v2214_v54, %v2017_v12  ;;  %v2384_v22 = vsel %vm3426_vm14, %v2711_v59, %v2383_v32 }
 0x190   : > { %2671 = vmatmul.msk.bf16.gmra.mxu2 %vm1733_vm15, %v1912_v37 }
 0x195   : > { %2691 = vmatmul.msk.bf16.vlgmr.msrb.gmra.mxu1 %vm1733_vm15, %v2151_v7 }
 0x199   : > { %2702 = vmatmul.msk.bf16.vlgmr.msra.gmra.mxu3 %vm1733_vm15, %v3488_v27  ;;  %v2138_v27 = vshll.u32 %v1708_v17, 16 }
 0x19b   : > { %v2140_v43 = vrot.slane %v2138_v27, 5 }
 0x19d   : > { %2707 = vmatmul.msk.bf16.vlgmr.msra.gmra.mxu0 %vm1733_vm15, %v3528_v9  ;;  %v2141_v53 = vor.u32 %v2140_v43, %v2137_v34  ;;  %v2320_v9 = vshrl.u32 %v1710_v13, 16 }
 0x19f   : > { %v2142_v56 = vrot.slane %v2141_v53, 4 }
 0x1a0   : > { %2697 = vmatmul.msk.bf16.vlgmr.msrb.gmra.mxu2 %vm1733_vm15, %v2215_v35 }
 0x1a1   : > { %v2147_v24 = vsel %vm3012_vm4, %v2142_v56, %v2146_v40 }
 0x1a2   : > { %v2150_v8 = vunpack.c.l.b16 %v2147_v24 }
 0x1a4   : > { %v2154_v38 = vpack.c.b16 %v2150_v8, %v1908_v21 }
 0x1a5   : > { %2692 = vmatmul.msk.bf16.gmra.mxu1 %vm1733_vm15, %v2152_v6 }
 0x1a9   : > { %2703 = vmatmul.msk.bf16.gmra.mxu3 %vm1733_vm15, %v3538_v41  ;;  %v2323_v41 = vshll.u32 %v1710_v13, 16 }
 0x1ab   : > { %v2325_v3 = vrot.slane %v2323_v41, 5 }
 0x1ad   : > { %2708 = vmatmul.msk.bf16.gmra.mxu0 %vm1733_vm15, %v3578_v19  ;;  %v2322_v19 = vrot.slane %v2320_v9, 4 }
 0x1af   : > { %v2326_v44 = vor.u32 %v2325_v3, %v2322_v19 }
 0x1b0   : > { %2698 = vmatmul.msk.bf16.gmra.mxu2 %vm1733_vm15, %v2216_v29 }
 0x1b1   : > { %v2327_v63 = vrot.slane %v2326_v44, 4 }
 0x1b5   : > { %2693 = vmatmul.msk.bf16.gmra.mxu1 %vm1733_vm15, %v2153_v39 }
 0x1b9   : > { %2704 = vmatmul.msk.bf16.gmra.mxu3 %vm1733_vm15, %v1732_v46  ;;  %v2332_v46 = vsel %vm3012_vm4, %v2327_v63, %v2331_v48 }
 0x1ba   : > { %v2335_v52 = vunpack.c.l.b16 %v2332_v46 }
 0x1bc   : > { %v2336_v50 = vpack.c.b16 %v2335_v52, %v2150_v8 }
 0x1bd   : > { %2709 = vmatmul.msk.bf16.gmra.mxu0 %vm1733_vm15, %v1912_v37 }
 0x1c0   : > { %2699 = vmatmul.msk.bf16.gmra.mxu2 %vm1733_vm15, %v2217_v57 }
 0x1c5   : > { %2694 = vmatmul.msk.bf16.gmra.mxu1 %vm1733_vm15, %v2154_v38 }
 0x1c9   : > { %2705 = vmatmul.msk.bf16.gmra.mxu3 %vm1733_vm15, %v2275_v55 }
 0x1cd   : > { %2710 = vmatmul.msk.bf16.gmra.mxu0 %vm1733_vm15, %v2336_v50 }
 0x1d0   : > { %2700 = vmatmul.msk.bf16.gmra.mxu2 %vm1733_vm15, %v2218_v10 }
 0x1d2   : > { %v1759_v33 = vpop.f32.mrf.mxu1 }
 0x1d3   : > { %v1779_v31 = vadd.f32 %v2764_v26, %v1759_v33 }
 0x1d5   : > { %2713 = vmatmul.msk.bf16.vlgmr.msra.gmra.mxu1 %vm1733_vm15, %v3501_v28 }
 0x1da   : > { %v1761_v5 = vpop.f32.mrf.mxu1  ;;  %v2106_v37 = vpop.f32.mrf.mxu0 }
 0x1db   : > { %v1780_v61 = vadd.f32 %v2764_v26, %v1761_v5 }
 0x1dc   : > { %v2046_v21 = vpop.f32.mrf.mxu3 }
 0x1e0   : > { %2717 = vmatmul.msk.bf16.vlgmr.msra.gmra.mxu2 %vm687_vm1, %v3154_v36 }
 0x1e2   : > { %v1764_v47 = vpop.f32.mrf.mxu1  ;;  %v2108_v34 = vpop.f32.mrf.mxu0 }
 0x1e3   : > { %v1937_v12 = vpop.f32.mrf.mxu2  ;;  %v1781_v15 = vadd.f32 %v2764_v26, %v1764_v47 }
 0x1e4   : > { %v3665_v4 = vadd.f32 %v1937_v12, %v1779_v31  ;;  %v2048_v1 = vpop.f32.mrf.mxu3 }
 0x1e5   : > { %2714 = vmatmul.msk.bf16.gmra.mxu1 %vm1733_vm15, %v3554_v30 }
 0x1e6   : > { %v2066_v12 = vadd.f32 %v2046_v21, %v3665_v4  ;;  %v3739_v21 = vld [vmem:[%s3809_s6] ss:$0 sm:$0xff] }
 0x1ea   : > { %v1766_v17 = vpop.f32.mrf.mxu1 }
 0x1eb   : > { %v1939_v0 = vpop.f32.mrf.mxu2  ;;  %v1782_v23 = vadd.f32 %v2764_v26, %v1766_v17 }
 0x1ec   : > { %v3669_v28 = vadd.f32 %v1939_v0, %v1780_v61  ;;  %v2051_v39 = vpop.f32.mrf.mxu3 }
 0x1ee   : > { %v2067_v59 = vadd.f32 %v2048_v1, %v3669_v28 }
 0x1f0   : > { %2718 = vmatmul.msk.bf16.gmra.mxu2 %vm687_vm1, %v3177_v45  ;;  %v2387_v45 = vunpack.c.l.b16 %v2384_v22  ;;  %v2127_v22 = vadd.f32 %v2108_v34, %v2067_v59 }
 0x1f2   : > { %v1769_v25 = vpop.f32.mrf.mxu1 }
 0x1f3   : > { %v1942_v62 = vpop.f32.mrf.mxu2  ;;  %v1783_v10 = vadd.f32 %v2764_v26, %v1769_v25 }
 0x1f4   : > { %v3673_v36 = vadd.f32 %v1942_v62, %v1781_v15  ;;  %v2053_v19 = vpop.f32.mrf.mxu3  ;;  %v2126_v15 = vadd.f32 %v2106_v37, %v2066_v12 }
 0x1f5   : > { %2715 = vmatmul.msk.bf16.gmra.mxu1 %vm1733_vm15, %v3602_v16  ;;  %v2388_v16 = vpack.c.b16 %v2387_v45, %v2214_v54  ;;  %v2111_v54 = vpop.f32.mrf.mxu0 }
 0x1f6   : > { %v2068_v37 = vadd.f32 %v2051_v39, %v3673_v36 }
 0x1fa   : > { %v1771_v30 = vpop.f32.mrf.mxu1 }
 0x1fb   : > { %v1944_v18 = vpop.f32.mrf.mxu2  ;;  %v1784_v27 = vadd.f32 %v2764_v26, %v1771_v30 }
 0x1fc   : > { %v3677_v2 = vadd.f32 %v1944_v18, %v1782_v23  ;;  %v3698_v24 = vpop.f32.mrf.mxu3 }
 0x1fd   : > { %v3696_v3 = vpop.f32.mrf.mxu0 }
 0x200   : > { %2719 = vmatmul.msk.bf16.gmra.mxu2 %vm687_vm1, %v3200_v49 }
 0x202   : > { %v1774_v7 = vpop.f32.mrf.mxu1 }
 0x203   : > { %v1947_v35 = vpop.f32.mrf.mxu2  ;;  %v1785_v49 = vadd.f32 %v2764_v26, %v1774_v7 }
 0x204   : > { %v3685_v6 = vadd.f32 %v1947_v35, %v1783_v10  ;;  %v3702_v57 = vpop.f32.mrf.mxu3 }
 0x205   : > { %2716 = vmatmul.msk.bf16.gmra.mxu1 %vm1733_vm15, %v2388_v16 }
 0x20a   : > { %v1776_v51 = vpop.f32.mrf.mxu1 }
 0x20b   : > { %v1949_v29 = vpop.f32.mrf.mxu2  ;;  %v1786_v9 = vadd.f32 %v2764_v26, %v1776_v51 }
 0x20c   : > { %v3688_v43 = vadd.f32 %v1949_v29, %v1784_v27  ;;  %v3710_v11 = vpop.f32.mrf.mxu3  ;;  %v2128_v27 = vadd.f32 %v2111_v54, %v2068_v37 }
 0x210   : > { %2720 = vmatmul.msk.bf16.gmra.mxu2 %vm687_vm1, %v3221_v20  ;;  %v3700_v20 = vpop.f32.mrf.mxu0 }
 0x212   : > { %v2179_v13 = vpop.f32.mrf.mxu1 }
 0x213   : > { %v1952_v53 = vpop.f32.mrf.mxu2  ;;  %v2199_v25 = vadd.f32 %v2179_v13, %v2126_v15  ;;  %v2069_v13 = vadd.f32 %v2053_v19, %v3677_v2  ;;  %v2070_v2 = vadd.f32 %v3698_v24, %v3685_v6 }
 0x214   : > { %v3692_v60 = vadd.f32 %v1952_v53, %v1785_v49  ;;  %v3718_v33 = vpop.f32.mrf.mxu3 }
 0x218   : > { %v3706_v48 = vpop.f32.mrf.mxu0 }
 0x21a   : > { %v2181_v41 = vpop.f32.mrf.mxu1 }
 0x21b   : > { %v1954_v42 = vpop.f32.mrf.mxu2  ;;  %v2200_v4 = vadd.f32 %v2181_v41, %v2127_v22 }
 0x21c   : > { %v3694_v56 = vadd.f32 %v1954_v42, %v1786_v9  ;;  %v2291_v47 = vpop.f32.mrf.mxu3 }
 0x220   : > { %v3712_v55 = vpop.f32.mrf.mxu0 }
 0x222   : > { %v2184_v40 = vpop.f32.mrf.mxu1 }
 0x223   : > { %v2243_v14 = vpop.f32.mrf.mxu2  ;;  %v2201_v49 = vadd.f32 %v2184_v40, %v2128_v27 }
 0x224   : > { %v2293_v62 = vpop.f32.mrf.mxu3  ;;  %v2263_v32 = vadd.f32 %v2243_v14, %v2199_v25 }
 0x226   : > { %v2311_v45 = vadd.f32 %v2291_v47, %v2263_v32 }
 0x228   : > { %v3720_v5 = vpop.f32.mrf.mxu0 }
 0x22a   : > { %v2186_v44 = vpop.f32.mrf.mxu1 }
 0x22b   : > { %v2245_v58 = vpop.f32.mrf.mxu2 }
 0x22c   : > { %v2264_v28 = vadd.f32 %v2245_v58, %v2200_v4  ;;  %v2296_v7 = vpop.f32.mrf.mxu3  ;;  %v2129_v58 = vadd.f32 %v3696_v3, %v2069_v13 }
 0x22e   : > { %v2312_v51 = vadd.f32 %v2293_v62, %v2264_v28  ;;  %v2202_v12 = vadd.f32 %v2186_v44, %v2129_v58  ;;  %v2130_v62 = vadd.f32 %v3700_v20, %v2070_v2 }
 0x230   : > { %v2352_v61 = vpop.f32.mrf.mxu0 }
 0x231   : > { %v2372_v10 = vadd.f32 %v2352_v61, %v2311_v45 }
 0x232   : > { %v3704_v8 = vpop.f32.mrf.mxu1 }
 0x233   : > { %v2248_v63 = vpop.f32.mrf.mxu2  ;;  %v2203_v44 = vadd.f32 %v3704_v8, %v2130_v62 }
 0x234   : > { %v2265_v39 = vadd.f32 %v2248_v63, %v2201_v49  ;;  %v2298_v14 = vpop.f32.mrf.mxu3 }
 0x236   : > { %v2313_v54 = vadd.f32 %v2296_v7, %v2265_v39 }
 0x238   : > { %v2354_v30 = vpop.f32.mrf.mxu0 }
 0x239   : > { %v2373_v53 = vadd.f32 %v2354_v30, %v2312_v51  ;;  %v2071_v30 = vadd.f32 %v3702_v57, %v3688_v43  ;;  %v2072_v43 = vadd.f32 %v3710_v11, %v3692_v60  ;;  %v2073_v60 = vadd.f32 %v3718_v33, %v3694_v56 }
 0x23a   : > { %v3708_v38 = vpop.f32.mrf.mxu1 }
 0x23b   : > { %v2250_v46 = vpop.f32.mrf.mxu2  ;;  %v2131_v4 = vadd.f32 %v3706_v48, %v2071_v30  ;;  %v2132_v27 = vadd.f32 %v3712_v55, %v2072_v43  ;;  %v2133_v55 = vadd.f32 %v3720_v5, %v2073_v60 }
 0x23c   : > { %v2266_v19 = vadd.f32 %v2250_v46, %v2202_v12  ;;  %v2301_v32 = vpop.f32.mrf.mxu3 }
 0x23d   : > { %v2204_v8 = vadd.f32 %v3708_v38, %v2131_v4 }
 0x23e   : > { %v2314_v3 = vadd.f32 %v2298_v14, %v2266_v19 }
 0x240   : > { %v2357_v29 = vpop.f32.mrf.mxu0 }
 0x241   : > { %v2374_v63 = vadd.f32 %v2357_v29, %v2313_v54 }
 0x242   : > { %v3714_v52 = vpop.f32.mrf.mxu1 }
 0x243   : > { %v3716_v50 = vpop.f32.mrf.mxu2  ;;  %v2205_v38 = vadd.f32 %v3714_v52, %v2132_v27 }
 0x244   : > { %v2267_v24 = vadd.f32 %v3716_v50, %v2203_v44 }
 0x246   : > { %v2315_v37 = vadd.f32 %v2301_v32, %v2267_v24 }
 0x248   : > { %v2359_v61 = vpop.f32.mrf.mxu0 }
 0x249   : > { %v2375_v46 = vadd.f32 %v2359_v61, %v2314_v3 }
 0x24a   : > { %v3722_v26 = vpop.f32.mrf.mxu1 }
 0x24b   : > { %v3724_v31 = vpop.f32.mrf.mxu2 }
 0x24c   : > { %v2268_v57 = vadd.f32 %v3724_v31, %v2204_v8 }
 0x250   : > { %v2362_v6 = vpop.f32.mrf.mxu0 }
 0x251   : > { %v2376_v50 = vadd.f32 %v2362_v6, %v2315_v37 }
 0x252   : > { %v2404_v0 = vpop.f32.mrf.mxu1 }
 0x253   : > { %v3727_v17 = vpop.f32.mrf.mxu2  ;;  %v2424_v16 = vadd.f32 %v2404_v0, %v2372_v10  ;;  %v2303_v10 = vpop.f32.mrf.mxu3 }
 0x254   : > { %v2316_v51 = vadd.f32 %v2303_v10, %v2268_v57  ;;  %v2269_v11 = vadd.f32 %v3727_v17, %v2205_v38 }
 0x25a   : > { %v2406_v18 = vpop.f32.mrf.mxu1 }
 0x25b   : > { %v3732_v23 = vpop.f32.mrf.mxu2  ;;  %v2425_v41 = vadd.f32 %v2406_v18, %v2373_v53 }
 0x262   : > { %v2409_v36 = vpop.f32.mrf.mxu1 }
 0x263   : > { %v2449_v35 = vpop.f32.mrf.mxu2  ;;  %v2426_v15 = vadd.f32 %v2409_v36, %v2374_v63 }
 0x264   : > { %v2450_v1 = vadd.f32 %v3739_v21, %v2449_v35 }
 0x266   : > { %v2469_v34 = vadd.f32 %v2450_v1, %v2424_v16  ;;  %v2364_v1 = vpop.f32.mrf.mxu0 }
 0x267   : > { %v2377_v31 = vadd.f32 %v2364_v1, %v2316_v51 }
 0x268   : > { %2477 = vst.msk [vmem:[%s3746_s26] sm:$0xff] %vm1733_vm15, %v2469_v34  ;;  %v2306_v34 = vpop.f32.mrf.mxu3 }
 0x269   : > { %v2317_v39 = vadd.f32 %v2306_v34, %v2269_v11 }
 0x26a   : > { %v2411_v40 = vpop.f32.mrf.mxu1 }
 0x26b   : > { %v2451_v9 = vpop.f32.mrf.mxu2  ;;  %v2427_v45 = vadd.f32 %v2411_v40, %v2375_v46 }
 0x26c   : > { %v2452_v42 = vadd.f32 %v3739_v21, %v2451_v9 }
 0x26e   : > { %v2470_v47 = vadd.f32 %v2452_v42, %v2425_v41  ;;  %v2367_v9 = vpop.f32.mrf.mxu0  ;;  %v2206_v41 = vadd.f32 %v3722_v26, %v2133_v55 }
 0x26f   : > { %v2378_v33 = vadd.f32 %v2367_v9, %v2317_v39 }
 0x270   : > { %2478 = vst.msk [vmem:[%s3746_s26 + $0x8] sm:$0xff] %vm1733_vm15, %v2470_v47  ;;  %v2270_v56 = vadd.f32 %v3732_v23, %v2206_v41  ;;  %v2308_v58 = vpop.f32.mrf.mxu3 }
 0x272   : > { %v2414_v18 = vpop.f32.mrf.mxu1  ;;  %v2318_v54 = vadd.f32 %v2308_v58, %v2270_v56 }
 0x273   : > { %v2454_v0 = vpop.f32.mrf.mxu2  ;;  %v2428_v35 = vadd.f32 %v2414_v18, %v2376_v50 }
 0x274   : > { %v2455_v25 = vadd.f32 %v3739_v21, %v2454_v0 }
 0x276   : > { %v2471_v59 = vadd.f32 %v2455_v25, %v2426_v15  ;;  %v2369_v5 = vpop.f32.mrf.mxu0 }
 0x277   : > { %v2379_v61 = vadd.f32 %v2369_v5, %v2318_v54 }
 0x278   : > { %2479 = vst.msk [vmem:[%s3746_s26 + $0x10] sm:$0xff] %vm1733_vm15, %v2471_v59 }
 0x27a   : > { %v2416_v48 = vpop.f32.mrf.mxu1 }
 0x27b   : > { %v2456_v22 = vpop.f32.mrf.mxu2  ;;  %v2429_v49 = vadd.f32 %v2416_v48, %v2377_v31 }
 0x27c   : > { %v2457_v20 = vadd.f32 %v3739_v21, %v2456_v22 }
 0x27e   : > { %v2472_v28 = vadd.f32 %v2457_v20, %v2427_v45 }
 0x280   : > { %2480 = vst.msk [vmem:[%s3746_s26 + $0x18] sm:$0xff] %vm1733_vm15, %v2472_v28 }
 0x282   : > { %v2419_v52 = vpop.f32.mrf.mxu1 }
 0x283   : > { %v2459_v7 = vpop.f32.mrf.mxu2  ;;  %v2430_v42 = vadd.f32 %v2419_v52, %v2378_v33 }
 0x284   : > { %v2460_v16 = vadd.f32 %v3739_v21, %v2459_v7 }
 0x286   : > { %v2473_v29 = vadd.f32 %v2460_v16, %v2428_v35 }
 0x288   : > { %2481 = vst.msk [vmem:[%s3746_s26 + $0x20] sm:$0xff] %vm1733_vm15, %v2473_v29 }
 0x28a   : > { %v2421_v12 = vpop.f32.mrf.mxu1 }
 0x28b   : > { %v2461_v36 = vpop.f32.mrf.mxu2  ;;  %v2431_v26 = vadd.f32 %v2421_v12, %v2379_v61 }
 0x28c   : > { %v2462_v13 = vadd.f32 %v3739_v21, %v2461_v36 }
 0x28e   : > { %v2474_v53 = vadd.f32 %v2462_v13, %v2429_v49 }
 0x290   : > { %2482 = vst.msk [vmem:[%s3746_s26 + $0x28] sm:$0xff] %vm1733_vm15, %v2474_v53 }
 0x293   : > { %v2464_v17 = vpop.f32.mrf.mxu2 }
 0x294   : > { %v2465_v14 = vadd.f32 %v3739_v21, %v2464_v17 }
 0x296   : > { %v2475_v47 = vadd.f32 %v2465_v14, %v2430_v42 }
 0x298   : > { %2483 = vst.msk [vmem:[%s3746_s26 + $0x30] sm:$0xff] %vm1733_vm15, %v2475_v47 }
 0x29b   : > { %v2466_v40 = vpop.f32.mrf.mxu2 }
 0x29c   : > { %v2467_v2 = vadd.f32 %v3739_v21, %v2466_v40 }
 0x29e   : > { %v2476_v19 = vadd.f32 %v2467_v2, %v2431_v26 }
 0x2a0   : > { %2484 = vst.msk [vmem:[%s3746_s26 + $0x38] sm:$0xff] %vm1733_vm15, %v2476_v19 }
 0x2a1 PF: > { %p14_p9 = scmp.ge.s32.totalorder %s2848_s28, 4   ;;  %s3819_s24 = smov %s2784_s25 }
 0x2a2   : > { %s3820_s25 = smov %s2857_s8  ;;  %s3821_s26 = smov %s2848_s28 }
 0x2a3   :  { %16 = sbr.rel (!%p14_p9) target bundleno = 2 (0x2), region = 144 }

</bundles_post_ra>
